<compile_context>
chip_gen: v7x
topology: tpu7x:2x2x1
jax: 0.10.0
libtpu: 0.0.40
codegen_flags: <defaults>
</compile_context>

<pallas_src>
from functools import partial

import jax
import jax.numpy as jnp
from jax.experimental import pallas as pl
from jax.experimental.pallas import tpu as pltpu

LOG2 = 0.6931471805599453
LANE = 128


def _ssp(x):
    # shifted softplus, single-exp stable form
    return jnp.maximum(x, 0.0) + jnp.log1p(jnp.exp(-jnp.abs(x))) - LOG2


def _elu(x):
    return jnp.where(x > 0, x, jnp.expm1(jnp.minimum(x, 0.0)))


# ---------------------------------------------------------------------------
# Kernel 1: per-edge pipeline.  Grid over E tiles only -> runs once per edge.
#   proj[e,:] = ( ((G@h)@Wn + bn) * SSP(SSP(e@We1+be1)@We2+be2) ) @ Wo
# ---------------------------------------------------------------------------
def edge_kernel(e_ref, g_ref, h_ref,
                wn_ref, bn_ref, we1_ref, be1_ref, we2_ref, be2_ref, wo_ref,
                proj_ref, *, compute_dtype):
    def mm(a, b):
        return jnp.dot(a.astype(compute_dtype), b.astype(compute_dtype),
                       preferred_element_type=jnp.float32)

    # Gather-then-project (exact reorder: one-hot rows of G sum to 1).
    hv = mm(mm(g_ref[...], h_ref[...]), wn_ref[...]) + bn_ref[...]   # (tE, HID)

    # Edge MLP: SSP(Linear(SSP(Linear(e)))) -- activations in f32.
    he = _ssp(mm(e_ref[...], we1_ref[...]) + be1_ref[...])
    he = _ssp(mm(he, we2_ref[...]) + be2_ref[...])                   # (tE, HID)

    msg = hv * he                                                    # (tE, HID)

    # Project before scatter (exact by linearity); bias bo added in kernel 2.
    proj_ref[...] = mm(msg, wo_ref[...]).astype(proj_ref.dtype)      # (tE, OUT)


# ---------------------------------------------------------------------------
# Kernel 2: scatter-sum over destination nodes + bias + SSP + ELU.
#   out[n,:] = ELU(SSP( sum_e S[n,e] * proj[e,:] + bo ))
# ---------------------------------------------------------------------------
def scatter_kernel(s_ref, proj_ref, bo_ref, out_ref, acc_ref, *, compute_dtype):
    k = pl.program_id(1)

    @pl.when(k == 0)
    def _init():
        acc_ref[...] = jnp.zeros_like(acc_ref)

    acc_ref[...] += jnp.dot(s_ref[...].astype(compute_dtype),
                            proj_ref[...].astype(compute_dtype),
                            preferred_element_type=jnp.float32)

    @pl.when(k == pl.num_programs(1) - 1)
    def _finish():
        out_ref[...] = _elu(_ssp(acc_ref[...] + bo_ref[...])).astype(out_ref.dtype)


def _round_up(x, m):
    return ((x + m - 1) // m) * m


def _pad2(x, rows, cols, dtype):
    x = jnp.asarray(x, dtype)
    return jnp.pad(x, ((0, rows - x.shape[0]), (0, cols - x.shape[1])))


def _vmem_limit(nbytes):
    # actual residency * 1.5 + 4 MiB headroom, floor 16 MiB.
    # Capped at 100 MiB (below v5e/v6e physical 128 MiB); on v7x (64 MiB
    # physical) shrink tile_e/tile_n so the estimate stays well under 64 MiB.
    return int(min(max(1.5 * nbytes + (4 << 20), 16 << 20), 100 << 20))


def ssp_forward(h, edge_feats, gather, scatter, params, *,
                use_bf16=True, tile_n=256, tile_e=512):
    """Eval-mode forward of SSP (dropout -> CFConv -> ELU -> dropout)."""
    N, node_in = h.shape
    E, edge_in = edge_feats.shape
    hid = params["wn"].shape[1]
    out_size = params["wo"].shape[1]

    # Lane-pad every matmul dimension to a multiple of 128.
    F_NODE = _round_up(node_in, LANE)
    F_EDGE = _round_up(edge_in, LANE)
    HID = _round_up(hid, LANE)
    OUT = _round_up(out_size, LANE)

    # Node tile: multiple of 16 (bf16 sublane packing). Edge tile: lane dim of
    # the scatter operator -> multiple of 128.
    tN = min(_round_up(tile_n, 16), _round_up(N, 16))
    N_pad = _round_up(N, tN)
    tE = min(_round_up(tile_e, LANE), _round_up(E, LANE))
    E_pad = _round_up(E, tE)

    compute_dtype = jnp.bfloat16 if use_bf16 else jnp.float32
    csize = jnp.dtype(compute_dtype).itemsize

    # Pad (and cast matmul-side operands); biases stay f32 for exact f32 adds.
    h_p = _pad2(h, N_pad, F_NODE, compute_dtype)
    e_p = _pad2(edge_feats, E_pad, F_EDGE, compute_dtype)
    g_p = _pad2(gather, E_pad, N_pad, compute_dtype)       # 0/1 exact in bf16
    s_p = _pad2(scatter, N_pad, E_pad, compute_dtype)      # 0/1 exact in bf16
    wn_p = _pad2(params["wn"], F_NODE, HID, compute_dtype)
    we1_p = _pad2(params["we1"], F_EDGE, HID, compute_dtype)
    we2_p = _pad2(params["we2"], HID, HID, compute_dtype)
    wo_p = _pad2(params["wo"], HID, OUT, compute_dtype)
    bn_p = _pad2(params["bn"], 1, HID, jnp.float32)
    be1_p = _pad2(params["be1"], 1, HID, jnp.float32)
    be2_p = _pad2(params["be2"], 1, HID, jnp.float32)
    bo_p = _pad2(params["bo"], 1, OUT, jnp.float32)

    def resident():
        # whole array mapped into VMEM once, single-buffered (not pipelined)
        return pl.BlockSpec(memory_space=pltpu.MemorySpace.VMEM)

    # ----------------------- kernel 1: edge pipeline -----------------------
    k1_bytes = ((h_p.size + wn_p.size + we1_p.size + we2_p.size + wo_p.size) * csize
                + (bn_p.size + be1_p.size + be2_p.size) * 4
                + 2 * (tE * F_EDGE + tE * N_pad + tE * OUT) * csize   # pipelined tiles
                + 6 * tE * HID * 4)                                   # f32 temporaries

    proj = pl.pallas_call(
        partial(edge_kernel, compute_dtype=compute_dtype),
        out_shape=jax.ShapeDtypeStruct((E_pad, OUT), compute_dtype),
        grid_spec=pltpu.PrefetchScalarGridSpec(
            num_scalar_prefetch=0,
            grid=(E_pad // tE,),
            in_specs=[
                pl.BlockSpec((tE, F_EDGE), lambda k: (k, 0)),   # edge-feature tile
                pl.BlockSpec((tE, N_pad), lambda k: (k, 0)),    # gather (G) tile
                resident(),                                     # h (full, 1 copy)
                resident(), resident(),                         # Wn, bn
                resident(), resident(),                         # We1, be1
                resident(), resident(),                         # We2, be2
                resident(),                                     # Wo
            ],
            out_specs=pl.BlockSpec((tE, OUT), lambda k: (k, 0)),
        ),
        compiler_params=pltpu.CompilerParams(
            dimension_semantics=("parallel",),
            vmem_limit_bytes=_vmem_limit(k1_bytes),
        ),
    )(e_p, g_p, h_p, wn_p, bn_p, we1_p, be1_p, we2_p, be2_p, wo_p)

    # -------------------- kernel 2: scatter + activations ------------------
    k2_bytes = (bo_p.size * 4
                + 2 * (tN * tE + tE * OUT) * csize    # S / proj pipeline buffers
                + 2 * tN * OUT * 4                    # output pipeline buffers
                + tN * OUT * 4)                       # accumulator scratch

    out_p = pl.pallas_call(
        partial(scatter_kernel, compute_dtype=compute_dtype),
        out_shape=jax.ShapeDtypeStruct((N_pad, OUT), jnp.float32),
        grid_spec=pltpu.PrefetchScalarGridSpec(
            num_scalar_prefetch=0,
            grid=(N_pad // tN, E_pad // tE),
            in_specs=[
                pl.BlockSpec((tN, tE), lambda i, k: (i, k)),    # scatter (S) tile
                pl.BlockSpec((tE, OUT), lambda i, k: (k, 0)),   # proj tile
                resident(),                                     # bo
            ],
            out_specs=pl.BlockSpec((tN, OUT), lambda i, k: (i, 0)),
            scratch_shapes=[pltpu.VMEM((tN, OUT), jnp.float32)],
        ),
        compiler_params=pltpu.CompilerParams(
            dimension_semantics=("parallel", "arbitrary"),
            vmem_limit_bytes=_vmem_limit(k2_bytes),
        ),
    )(s_p, proj, bo_p)

    return out_p[:N, :out_size]


def ssp_reference(h, e, gather, scatter, params):
    """Pure-JAX reference (eval-mode forward of the PyTorch module)."""
    def ssp(x):
        return jnp.logaddexp(x, 0.0) - LOG2
    hv = h @ params["wn"] + params["bn"]
    he = ssp(e @ params["we1"] + params["be1"])
    he = ssp(he @ params["we2"] + params["be2"])
    msg = (gather @ hv) * he
    agg = scatter @ msg
    out = ssp(agg @ params["wo"] + params["bo"])
    return jnp.where(out > 0, out, jnp.expm1(jnp.minimum(out, 0.0)))


def init_params(key, node_in, edge_in, hid, out):
    ks = jax.random.split(key, 4)

    def lin(k, fan_in, fan_out):
        scale = 1.0 / jnp.sqrt(fan_in)
        return (jax.random.uniform(k, (fan_in, fan_out), jnp.float32, -scale, scale),
                jnp.zeros((1, fan_out), jnp.float32))

    wn, bn = lin(ks[0], node_in, hid)
    we1, be1 = lin(ks[1], edge_in, hid)
    we2, be2 = lin(ks[2], hid, hid)
    wo, bo = lin(ks[3], hid, out)
    return dict(wn=wn, bn=bn, we1=we1, be1=be1, we2=we2, be2=be2, wo=wo, bo=bo)


if __name__ == "__main__":
    key = jax.random.PRNGKey(0)
    k_h, k_e, k_p = jax.random.split(key, 3)

    # small synthetic graph: N nodes, E directed edges
    N, E = 8, 16
    node_in, edge_in, hid_size, out_size, heads = 8, 8, 32, 16, 4  # heads unused by forward

    h = jax.random.normal(k_h, (N, node_in), jnp.float32)
    edge_feats = jax.random.normal(k_e, (E, edge_in), jnp.float32)

    # deterministic edge list -> dense one-hot gather/scatter operators
    src = jnp.arange(E, dtype=jnp.int32) % N
    dst = (jnp.arange(E, dtype=jnp.int32) * 3 + 1) % N
    gather = jax.nn.one_hot(src, N, dtype=jnp.float32)        # (E, N)
    scatter = jax.nn.one_hot(dst, N, dtype=jnp.float32).T     # (N, E)

    params = init_params(k_p, node_in, edge_in, hid_size, out_size)
    ref = ssp_reference(h, edge_feats, gather, scatter, params)

    # default path: bf16 MXU operands, f32 accumulation / f32 activations
    out_bf16 = ssp_forward(h, edge_feats, gather, scatter, params)
    jax.block_until_ready(out_bf16)
    assert out_bf16.shape == (N, out_size) and out_bf16.dtype == jnp.float32
    assert bool(jnp.all(jnp.isfinite(out_bf16)))
    assert bool(jnp.allclose(out_bf16, ref, rtol=5e-2, atol=5e-2))

    # f32-storage path (default MXU precision, i.e. not guaranteed exact f32)
    out_f32 = ssp_forward(h, edge_feats, gather, scatter, params, use_bf16=False)
    jax.block_until_ready(out_f32)
    assert out_f32.shape == (N, out_size)
    assert bool(jnp.all(jnp.isfinite(out_f32)))
    assert bool(jnp.allclose(out_f32, ref, rtol=1e-4, atol=1e-4))

    print("KERNEL_OK")
</pallas_src>

<mosaic_0001>
module attributes {stable_mosaic.version = 11 : i64} {
  func.func @edge_kernel(%arg0: i32, %arg1: memref<128x128xbf16, #tpu.memory_space<vmem>>, %arg2: memref<128x16xbf16, #tpu.memory_space<vmem>>, %arg3: memref<16x128xbf16, #tpu.memory_space<vmem>>, %arg4: memref<128x128xbf16, #tpu.memory_space<vmem>>, %arg5: memref<1x128xf32, #tpu.memory_space<vmem>>, %arg6: memref<128x128xbf16, #tpu.memory_space<vmem>>, %arg7: memref<1x128xf32, #tpu.memory_space<vmem>>, %arg8: memref<128x128xbf16, #tpu.memory_space<vmem>>, %arg9: memref<1x128xf32, #tpu.memory_space<vmem>>, %arg10: memref<128x128xbf16, #tpu.memory_space<vmem>>, %arg11: memref<128x128xbf16, #tpu.memory_space<vmem>>) attributes {dimension_semantics = [#tpu.dimension_semantics<parallel>], iteration_bounds = array<i64: 1>, scalar_prefetch = 0 : i64, scratch_operands = 0 : i64, tpu.core_type = #tpu.core_type<tc>, window_params = [{transform_indices = @transform_0, window_bounds = array<i64: 128, 128>}, {transform_indices = @transform_1, window_bounds = array<i64: 128, 16>}, {pipeline_mode = #tpu.pipeline_mode<synchronous>, transform_indices = @transform_2, window_bounds = array<i64: 16, 128>}, {pipeline_mode = #tpu.pipeline_mode<synchronous>, transform_indices = @transform_3, window_bounds = array<i64: 128, 128>}, {pipeline_mode = #tpu.pipeline_mode<synchronous>, transform_indices = @transform_4, window_bounds = array<i64: 1, 128>}, {pipeline_mode = #tpu.pipeline_mode<synchronous>, transform_indices = @transform_5, window_bounds = array<i64: 128, 128>}, {pipeline_mode = #tpu.pipeline_mode<synchronous>, transform_indices = @transform_6, window_bounds = array<i64: 1, 128>}, {pipeline_mode = #tpu.pipeline_mode<synchronous>, transform_indices = @transform_7, window_bounds = array<i64: 128, 128>}, {pipeline_mode = #tpu.pipeline_mode<synchronous>, transform_indices = @transform_8, window_bounds = array<i64: 1, 128>}, {pipeline_mode = #tpu.pipeline_mode<synchronous>, transform_indices = @transform_9, window_bounds = array<i64: 128, 128>}, {transform_indices = @transform_10, window_bounds = array<i64: 128, 128>}]} {
    %c0 = arith.constant 0 : index
    %c0_0 = arith.constant 0 : index
    %0 = vector.load %arg2[%c0, %c0_0] : memref<128x16xbf16, #tpu.memory_space<vmem>>, vector<128x16xbf16>
    %c0_1 = arith.constant 0 : index
    %c0_2 = arith.constant 0 : index
    %1 = vector.load %arg3[%c0_1, %c0_2] : memref<16x128xbf16, #tpu.memory_space<vmem>>, vector<16x128xbf16>
    %cst = arith.constant dense<0.000000e+00> : vector<128x128xf32>
    %2 = tpu.matmul %0, %1, %cst {dimension_numbers = #tpu.dot_dimension_numbers<[1], [0], [0], [1], [0, 0, 1, 1], [], []>} : vector<128x16xbf16>, vector<16x128xbf16>, vector<128x128xf32> -> vector<128x128xf32>
    %c0_3 = arith.constant 0 : index
    %c0_4 = arith.constant 0 : index
    %3 = vector.load %arg4[%c0_3, %c0_4] : memref<128x128xbf16, #tpu.memory_space<vmem>>, vector<128x128xbf16>
    %4 = arith.truncf %2 : vector<128x128xf32> to vector<128x128xbf16>
    %cst_5 = arith.constant dense<0.000000e+00> : vector<128x128xf32>
    %5 = tpu.matmul %4, %3, %cst_5 {dimension_numbers = #tpu.dot_dimension_numbers<[1], [0], [0], [1], [0, 0, 1, 1], [], []>} : vector<128x128xbf16>, vector<128x128xbf16>, vector<128x128xf32> -> vector<128x128xf32>
    %c0_6 = arith.constant 0 : index
    %c0_7 = arith.constant 0 : index
    %6 = vector.load %arg5[%c0_6, %c0_7] : memref<1x128xf32, #tpu.memory_space<vmem>>, vector<1x128xf32>
    %7 = vector.broadcast %6 : vector<1x128xf32> to vector<128x128xf32>
    %8 = arith.addf %5, %7 : vector<128x128xf32>
    %c0_8 = arith.constant 0 : index
    %c0_9 = arith.constant 0 : index
    %9 = vector.load %arg1[%c0_8, %c0_9] : memref<128x128xbf16, #tpu.memory_space<vmem>>, vector<128x128xbf16>
    %c0_10 = arith.constant 0 : index
    %c0_11 = arith.constant 0 : index
    %10 = vector.load %arg6[%c0_10, %c0_11] : memref<128x128xbf16, #tpu.memory_space<vmem>>, vector<128x128xbf16>
    %cst_12 = arith.constant dense<0.000000e+00> : vector<128x128xf32>
    %11 = tpu.matmul %9, %10, %cst_12 {dimension_numbers = #tpu.dot_dimension_numbers<[1], [0], [0], [1], [0, 0, 1, 1], [], []>} : vector<128x128xbf16>, vector<128x128xbf16>, vector<128x128xf32> -> vector<128x128xf32>
    %c0_13 = arith.constant 0 : index
    %c0_14 = arith.constant 0 : index
    %12 = vector.load %arg7[%c0_13, %c0_14] : memref<1x128xf32, #tpu.memory_space<vmem>>, vector<1x128xf32>
    %13 = vector.broadcast %12 : vector<1x128xf32> to vector<128x128xf32>
    %14 = arith.addf %11, %13 : vector<128x128xf32>
    %cst_15 = arith.constant 0.000000e+00 : f32
    %15 = vector.broadcast %cst_15 : f32 to vector<128x128xf32>
    %16 = arith.maximumf %14, %15 : vector<128x128xf32>
    %17 = math.absf %14 : vector<128x128xf32>
    %cst_16 = arith.constant 0.000000e+00 : f32
    %18 = vector.broadcast %cst_16 : f32 to vector<128x128xf32>
    %19 = arith.subf %18, %17 : vector<128x128xf32>
    %20 = math.exp %19 : vector<128x128xf32>
    %21 = math.log1p %20 : vector<128x128xf32>
    %22 = arith.addf %16, %21 : vector<128x128xf32>
    %cst_17 = arith.constant 0.693147182 : f32
    %23 = vector.broadcast %cst_17 : f32 to vector<128x128xf32>
    %24 = arith.subf %22, %23 : vector<128x128xf32>
    %c0_18 = arith.constant 0 : index
    %c0_19 = arith.constant 0 : index
    %25 = vector.load %arg8[%c0_18, %c0_19] : memref<128x128xbf16, #tpu.memory_space<vmem>>, vector<128x128xbf16>
    %26 = arith.truncf %24 : vector<128x128xf32> to vector<128x128xbf16>
    %cst_20 = arith.constant dense<0.000000e+00> : vector<128x128xf32>
    %27 = tpu.matmul %26, %25, %cst_20 {dimension_numbers = #tpu.dot_dimension_numbers<[1], [0], [0], [1], [0, 0, 1, 1], [], []>} : vector<128x128xbf16>, vector<128x128xbf16>, vector<128x128xf32> -> vector<128x128xf32>
    %c0_21 = arith.constant 0 : index
    %c0_22 = arith.constant 0 : index
    %28 = vector.load %arg9[%c0_21, %c0_22] : memref<1x128xf32, #tpu.memory_space<vmem>>, vector<1x128xf32>
    %29 = vector.broadcast %28 : vector<1x128xf32> to vector<128x128xf32>
    %30 = arith.addf %27, %29 : vector<128x128xf32>
    %cst_23 = arith.constant 0.000000e+00 : f32
    %31 = vector.broadcast %cst_23 : f32 to vector<128x128xf32>
    %32 = arith.maximumf %30, %31 : vector<128x128xf32>
    %33 = math.absf %30 : vector<128x128xf32>
    %cst_24 = arith.constant 0.000000e+00 : f32
    %34 = vector.broadcast %cst_24 : f32 to vector<128x128xf32>
    %35 = arith.subf %34, %33 : vector<128x128xf32>
    %36 = math.exp %35 : vector<128x128xf32>
    %37 = math.log1p %36 : vector<128x128xf32>
    %38 = arith.addf %32, %37 : vector<128x128xf32>
    %cst_25 = arith.constant 0.693147182 : f32
    %39 = vector.broadcast %cst_25 : f32 to vector<128x128xf32>
    %40 = arith.subf %38, %39 : vector<128x128xf32>
    %41 = arith.mulf %8, %40 : vector<128x128xf32>
    %c0_26 = arith.constant 0 : index
    %c0_27 = arith.constant 0 : index
    %42 = vector.load %arg10[%c0_26, %c0_27] : memref<128x128xbf16, #tpu.memory_space<vmem>>, vector<128x128xbf16>
    %43 = arith.truncf %41 : vector<128x128xf32> to vector<128x128xbf16>
    %cst_28 = arith.constant dense<0.000000e+00> : vector<128x128xf32>
    %44 = tpu.matmul %43, %42, %cst_28 {dimension_numbers = #tpu.dot_dimension_numbers<[1], [0], [0], [1], [0, 0, 1, 1], [], []>} : vector<128x128xbf16>, vector<128x128xbf16>, vector<128x128xf32> -> vector<128x128xf32>
    %45 = arith.truncf %44 : vector<128x128xf32> to vector<128x128xbf16>
    %c0_29 = arith.constant 0 : index
    %c0_30 = arith.constant 0 : index
    %46 = vector.load %arg11[%c0_29, %c0_30] : memref<128x128xbf16, #tpu.memory_space<vmem>>, vector<128x128xbf16>
    tpu.vector_store %arg11[%c0_29, %c0_30], %45 {strides = array<i32>} : memref<128x128xbf16, #tpu.memory_space<vmem>>, vector<128x128xbf16>,
    return
  }
  func.func @transform_0(%arg0: i32) -> (i32, i32) {
    %c0_i32 = arith.constant 0 : i32
    %c0_i32_0 = arith.constant 0 : i32
    return %arg0, %c0_i32 : i32, i32
  }
  func.func @transform_1(%arg0: i32) -> (i32, i32) {
    %c0_i32 = arith.constant 0 : i32
    %c0_i32_0 = arith.constant 0 : i32
    return %arg0, %c0_i32 : i32, i32
  }
  func.func @transform_2(%arg0: i32) -> (i32, i32) {
    %c0_i32 = arith.constant 0 : i32
    %c0_i32_0 = arith.constant 0 : i32
    %c0_i32_1 = arith.constant 0 : i32
    return %c0_i32, %c0_i32_0 : i32, i32
  }
  func.func @transform_3(%arg0: i32) -> (i32, i32) {
    %c0_i32 = arith.constant 0 : i32
    %c0_i32_0 = arith.constant 0 : i32
    %c0_i32_1 = arith.constant 0 : i32
    return %c0_i32, %c0_i32_0 : i32, i32
  }
  func.func @transform_4(%arg0: i32) -> (i32, i32) {
    %c0_i32 = arith.constant 0 : i32
    %c0_i32_0 = arith.constant 0 : i32
    %c0_i32_1 = arith.constant 0 : i32
    return %c0_i32, %c0_i32_0 : i32, i32
  }
  func.func @transform_5(%arg0: i32) -> (i32, i32) {
    %c0_i32 = arith.constant 0 : i32
    %c0_i32_0 = arith.constant 0 : i32
    %c0_i32_1 = arith.constant 0 : i32
    return %c0_i32, %c0_i32_0 : i32, i32
  }
  func.func @transform_6(%arg0: i32) -> (i32, i32) {
    %c0_i32 = arith.constant 0 : i32
    %c0_i32_0 = arith.constant 0 : i32
    %c0_i32_1 = arith.constant 0 : i32
    return %c0_i32, %c0_i32_0 : i32, i32
  }
  func.func @transform_7(%arg0: i32) -> (i32, i32) {
    %c0_i32 = arith.constant 0 : i32
    %c0_i32_0 = arith.constant 0 : i32
    %c0_i32_1 = arith.constant 0 : i32
    return %c0_i32, %c0_i32_0 : i32, i32
  }
  func.func @transform_8(%arg0: i32) -> (i32, i32) {
    %c0_i32 = arith.constant 0 : i32
    %c0_i32_0 = arith.constant 0 : i32
    %c0_i32_1 = arith.constant 0 : i32
    return %c0_i32, %c0_i32_0 : i32, i32
  }
  func.func @transform_9(%arg0: i32) -> (i32, i32) {
    %c0_i32 = arith.constant 0 : i32
    %c0_i32_0 = arith.constant 0 : i32
    %c0_i32_1 = arith.constant 0 : i32
    return %c0_i32, %c0_i32_0 : i32, i32
  }
  func.func @transform_10(%arg0: i32) -> (i32, i32) {
    %c0_i32 = arith.constant 0 : i32
    %c0_i32_0 = arith.constant 0 : i32
    return %arg0, %c0_i32 : i32, i32
  }
}

</mosaic_0001>

<bundles_post_ra>
// kernel: tpu_custom_call.1
= control target key start
LH: loop header
LB: loop body
LE: loop exit
PB: predicated region body
PF: predicated region fallthrough
CT: control target
= control target key end

     0   :  { %15 = vsyncpa [#allocation3], 0  ;;  %s3105_s0 = inlined_call_operand.vmem [shape: bf16[128,128], index: 0, kind: input, shape index: {}]   ;;  %s3106_s1 = inlined_call_operand.vmem [shape: bf16[128,16], index: 1, kind: input, shape index: {}]   ;;  %s3107_s2 = inlined_call_operand.vmem [shape: bf16[16,128], index: 2, kind: input, shape index: {}]   ;;  %s3108_s3 = inlined_call_operand.hbm [shape: bf16[128,128], index: 3, kind: input, shape index: {}]   ;;  %s3109_s4 = inlined_call_operand.vmem [shape: f32[1,128], index: 4, kind: input, shape index: {}]   ;;  %s3110_s5 = inlined_call_operand.hbm [shape: bf16[128,128], index: 5, kind: input, shape index: {}]   ;;  %s3111_s6 = inlined_call_operand.vmem [shape: f32[1,128], index: 6, kind: input, shape index: {}]   ;;  %s3112_s7 = inlined_call_operand.hbm [shape: bf16[128,128], index: 7, kind: input, shape index: {}]   ;;  %s3113_s8 = inlined_call_operand.vmem [shape: f32[1,128], index: 8, kind: input, shape index: {}]   ;;  %s3114_s9 = inlined_call_operand.hbm [shape: bf16[128,128], index: 9, kind: input, shape index: {}]   ;;  %s3115_s10 = inlined_call_operand.hbm [shape: bf16[128,128], index: 10, kind: output, shape index: {}]  }
   0x1   :  { %16 = vsyncpa [#allocation6], 0 }
   0x2   :  { %17 = vsyncpa [#allocation9], 0 }
   0x3   :  { %18 = vsyncpa [#allocation4], 0  ;;  %s2350_s13 = smov [#allocation5]   ;;  %s2351_s15 = smov [#allocation2]  }
   0x4   :  { %s44_s14 = sshll.u32 %s2350_s13, 4  ;;  %s30_s16 = sshll.u32 %s2351_s15, 4  ;;  %s45_s14 = int_to_ptr.vmem [resolvable:$true] %s44_s14  ;;  %s2412_s16 = int_to_ptr.vmem [resolvable:$true] %s30_s16 }
   0x5   :  { %s2232_s19 = scalar_lea.hbm %s3110_s5, 1024 }
   0x6   :  { %p2233_p0 = scmp.ne.s32.totalorder %s3110_s5, %s2232_s19  ;;  %p2236_p1 = scmp.lt.u32.totalorder %s2232_s19, %s3110_s5 }
   0x8   :  { %p2238_p2 = pnand %p2236_p1, %p2233_p0 }
   0xa   :  { %2241 = shalt.err (!%p2238_p2)
}
   0xb   :  { %s2242_s24 = scalar_lea.vmem %s45_s14, 1024  ;;  %p2247_p4 = scmp.lt.s32.totalorder %s45_s14, %s45_s14 }
   0xc   :  { %p2243_p3 = scmp.ne.s32.totalorder %s45_s14, %s2242_s24  ;;  %p2248_p5 = scmp.lt.s32.totalorder %s2242_s24, %s2242_s24 }
   0xe   :  { %p2249_p6 = por %p2248_p5, %p2247_p4 }
  0x10   :  { %p2250_p7 = pnand %p2249_p6, %p2243_p3 }
  0x12   :  { %2253 = shalt.err (!%p2250_p7)
}
  0x13   :  { %s2352_s25 = smov 64   ;;  %s2353_s26 = smov 4  }
  0x14   :  { %50 = dma.hbm_to_vmem [thread:$0]  %s3110_s5, 1024, %s45_s14, [#allocation6], %s2352_s25, %s2352_s25, %s2353_s26  }
  0x15   :  { %s2254_s11 = scalar_lea.hbm %s3108_s3, 1024 }
  0x16   :  { %p2255_p8 = scmp.ne.s32.totalorder %s3108_s3, %s2254_s11  ;;  %p2258_p9 = scmp.lt.u32.totalorder %s2254_s11, %s3108_s3 }
  0x18   :  { %p2260_p10 = pnand %p2258_p9, %p2255_p8 }
  0x1a   :  { %2263 = shalt.err (!%p2260_p10)
}
  0x1b   :  { %s2264_s18 = scalar_lea.vmem %s2412_s16, 1024  ;;  %p2269_p12 = scmp.lt.s32.totalorder %s2412_s16, %s2412_s16 }
  0x1c   :  { %p2265_p11 = scmp.ne.s32.totalorder %s2412_s16, %s2264_s18  ;;  %p2270_p13 = scmp.lt.s32.totalorder %s2264_s18, %s2264_s18 }
  0x1e   :  { %p2271_p0 = por %p2270_p13, %p2269_p12 }
  0x20   :  { %p2272_p1 = pnand %p2271_p0, %p2265_p11 }
  0x22   :  { %2275 = shalt.err (!%p2272_p1)
}
  0x23   :  { %36 = dma.hbm_to_vmem [thread:$0]  %s3108_s3, 1024, %s2412_s16, [#allocation3], %s2352_s25, %s2352_s25, %s2353_s26  }
  0x24   :  { %s2354_s19 = smov [#allocation7]   ;;  %s2355_s21 = smov [#allocation8]  }
  0x25   :  { %s58_s20 = sshll.u32 %s2354_s19, 4  ;;  %s72_s22 = sshll.u32 %s2355_s21, 4  ;;  %s59_s20 = int_to_ptr.vmem [resolvable:$true] %s58_s20  ;;  %s2449_s22 = int_to_ptr.vmem [resolvable:$true] %s72_s22 }
  0x26   :  { %s2276_s27 = scalar_lea.hbm %s3112_s7, 1024 }
  0x27   :  { %p2277_p2 = scmp.ne.s32.totalorder %s3112_s7, %s2276_s27  ;;  %p2280_p3 = scmp.lt.u32.totalorder %s2276_s27, %s3112_s7 }
  0x29   :  { %p2282_p4 = pnand %p2280_p3, %p2277_p2 }
  0x2b   :  { %2285 = shalt.err (!%p2282_p4)
}
  0x2c   :  { %s2286_s3 = scalar_lea.vmem %s59_s20, 1024  ;;  %p2291_p6 = scmp.lt.s32.totalorder %s59_s20, %s59_s20 }
  0x2d   :  { %p2287_p5 = scmp.ne.s32.totalorder %s59_s20, %s2286_s3  ;;  %p2292_p7 = scmp.lt.s32.totalorder %s2286_s3, %s2286_s3 }
  0x2f   :  { %p2293_p8 = por %p2292_p7, %p2291_p6 }
  0x31   :  { %p2294_p9 = pnand %p2293_p8, %p2287_p5 }
  0x33   :  { %2297 = shalt.err (!%p2294_p9)
}
  0x34   :  { %64 = dma.hbm_to_vmem [thread:$0]  %s3112_s7, 1024, %s59_s20, [#allocation6], %s2352_s25, %s2352_s25, %s2353_s26  }
  0x35   :  { %s2298_s17 = scalar_lea.hbm %s3114_s9, 1024 }
  0x36   :  { %p2299_p10 = scmp.ne.s32.totalorder %s3114_s9, %s2298_s17  ;;  %p2302_p11 = scmp.lt.u32.totalorder %s2298_s17, %s3114_s9 }
  0x38   :  { %p2304_p12 = pnand %p2302_p11, %p2299_p10 }
  0x3a   :  { %2307 = shalt.err (!%p2304_p12)
}
  0x3b   :  { %s2308_s21 = scalar_lea.vmem %s2449_s22, 1024  ;;  %p2313_p0 = scmp.lt.s32.totalorder %s2449_s22, %s2449_s22 }
  0x3c   :  { %p2309_p13 = scmp.ne.s32.totalorder %s2449_s22, %s2308_s21  ;;  %p2314_p1 = scmp.lt.s32.totalorder %s2308_s21, %s2308_s21 }
  0x3e   :  { %p2315_p2 = por %p2314_p1, %p2313_p0 }
  0x40   :  { %p2316_p3 = pnand %p2315_p2, %p2309_p13 }
  0x42   :  { %2319 = shalt.err (!%p2316_p3)
}
  0x43   :  { %78 = dma.hbm_to_vmem [thread:$0]  %s3114_s9, 1024, %s2449_s22, [#allocation9], %s2352_s25, %s2352_s25, %s2353_s26  }
  0x44   :  { %2342 = dma.done.wait [#allocation3], 1024  }
  0x45   :  { %2343 = vsyncadd [#allocation3], 4294966272 }
  0x46   :  { %2344 = dma.done.wait [#allocation6], 2048  }
  0x47   :  { %2345 = vsyncadd [#allocation6], 4294965248 }
  0x48   :  { %2346 = dma.done.wait [#allocation9], 1024  }
  0x49   :  { %2347 = vsyncadd [#allocation9], 4294966272  ;;  %v2055_v0 = vld [vmem:[%s3107_s2] sm:$0xff]   ;;  %vm156_vm0 = vcmask 130048   ;;  %v2057_v2 = vld [vmem:[%s3106_s1 + $0x8] sm:$0xff]  }
  0x4a   :  { %v2056_v1 = vld [vmem:[%s3106_s1] sm:$0xff]   ;;  %1902 = vmatprep.subr.bf16.mxu0 %v2055_v0  ;;  %v2059_v4 = vld [vmem:[#allocation5 + $0x8] sm:$0xff]   ;;  %v2060_v5 = vld [vmem:[%s3106_s1 + $0x10] sm:$0xff]  }
  0x4b   :  { %1903 = vmatpush3.bf16.msra.mxu0 %v2055_v0  ;;  %1904 = vmatprep.mubr.msk.bf16.mxu0 %vm156_vm0, %v2056_v1  ;;  %v2058_v3 = vld [vmem:[#allocation5] sm:$0xff]   ;;  %v2062_v6 = vld [vmem:[#allocation5 + $0x10] sm:$0xff]   ;;  %v2061_v7 = vld [vmem:[%s3106_s1 + $0x18] sm:$0xff]  }
  0x4c   :  { %1952 = vmatprep.subr.bf16.mxu0 %v2058_v3  ;;  %v2064_v8 = vld [vmem:[%s3106_s1 + $0x20] sm:$0xff]   ;;  %v2063_v9 = vld [vmem:[#allocation5 + $0x18] sm:$0xff]   ;;  %v2065_v11 = vld [vmem:[%s3106_s1 + $0x28] sm:$0xff]  }
  0x4d   :  { %v2066_v10 = vld [vmem:[#allocation5 + $0x20] sm:$0xff]   ;;  %v2068_v12 = vld [vmem:[%s3106_s1 + $0x30] sm:$0xff]   ;;  %v2067_v13 = vld [vmem:[#allocation5 + $0x28] sm:$0xff]  }
  0x4e   :  { %1905 = vmatmul.mubr.msk.bf16.vlgmr.msra.gmra.mrb[0].mxu0 %vm156_vm0, %v2057_v2  ;;  %v2069_v14 = vld [vmem:[%s3106_s1 + $0x38] sm:$0xff]   ;;  %v2070_v15 = vld [vmem:[#allocation5 + $0x30] sm:$0xff]   ;;  %v2080_v16 = vld [vmem:[#allocation2] sm:$0xff]  }
  0x4f   :  { %1953 = vmatpush3.bf16.msra.mxu0 %v2058_v3  ;;  %1908 = vmatprep.mubr.msk.bf16.mxu0 %vm156_vm0, %v2060_v5  ;;  %v2081_v17 = vld [vmem:[#allocation2 + $0x8] sm:$0xff]   ;;  %v2072_v18 = vld [vmem:[%s3105_s0] sm:$0xff]   ;;  %v2071_v19 = vld [vmem:[#allocation5 + $0x38] sm:$0xff]  }
  0x50   :  { %1954 = vmatprep.subr.bf16.mxu0 %v2059_v4  ;;  %1920 = vmatprep.subr.bf16.mxu1 %v2080_v16  ;;  %v2082_v20 = vld [vmem:[#allocation2 + $0x10] sm:$0xff]   ;;  %v2083_v21 = vld [vmem:[#allocation2 + $0x18] sm:$0xff]   ;;  %v2073_v22 = vld [vmem:[%s3105_s0 + $0x8] sm:$0xff]  }
  0x51   :  { %1921 = vmatpush3.bf16.msra.mxu1 %v2080_v16  ;;  %v2074_v23 = vld [vmem:[%s3105_s0 + $0x10] sm:$0xff]   ;;  %v2084_v24 = vld [vmem:[#allocation2 + $0x20] sm:$0xff]   ;;  %v2085_v25 = vld [vmem:[#allocation2 + $0x28] sm:$0xff]  }
  0x52   :  { %1922 = vmatprep.subr.bf16.mxu1 %v2081_v17  ;;  %v2075_v26 = vld [vmem:[%s3105_s0 + $0x18] sm:$0xff]   ;;  %v2076_v27 = vld [vmem:[%s3105_s0 + $0x20] sm:$0xff]   ;;  %v2086_v28 = vld [vmem:[#allocation2 + $0x30] sm:$0xff]  }
  0x53   :  { %1955 = vmatpush3.bf16.msra.mxu0 %v2059_v4  ;;  %v2077_v29 = vld [vmem:[%s3105_s0 + $0x28] sm:$0xff]   ;;  %v2078_v30 = vld [vmem:[%s3105_s0 + $0x30] sm:$0xff]   ;;  %v2079_v31 = vld [vmem:[%s3105_s0 + $0x38] sm:$0xff]  }
  0x54   :  { %1956 = vmatprep.subr.bf16.mxu0 %v2062_v6  ;;  %v2087_v32 = vld [vmem:[#allocation2 + $0x38] sm:$0xff]   ;;  %v2088_v33 = vld [vmem:[#allocation7] sm:$0xff]   ;;  %v2089_v40 = vld [vmem:[#allocation7 + $0x8] sm:$0xff]  }
  0x55   :  { %1923 = vmatpush3.bf16.msra.mxu1 %v2081_v17  ;;  %v2090_v43 = vld [vmem:[#allocation7 + $0x10] sm:$0xff]   ;;  %v2091_v48 = vld [vmem:[#allocation7 + $0x18] sm:$0xff]   ;;  %v2092_v51 = vld [vmem:[#allocation7 + $0x20] sm:$0xff]  }
  0x56   :  { %1909 = vmatmul.mubr.msk.bf16.gmra.mrb[4].mxu0 %vm156_vm0, %v2061_v7  ;;  %1924 = vmatprep.subr.bf16.mxu1 %v2082_v20  ;;  %v2093_v56 = vld [vmem:[#allocation7 + $0x28] sm:$0xff]   ;;  %v2094_v59 = vld [vmem:[#allocation7 + $0x30] sm:$0xff]   ;;  %v2095_v0 = vld [vmem:[#allocation7 + $0x38] sm:$0xff]  }
  0x57   :  { %1957 = vmatpush3.bf16.msra.mxu0 %v2062_v6  ;;  %1912 = vmatprep.mubr.msk.bf16.mxu0 %vm156_vm0, %v2064_v8  ;;  %v2548_v1 = vld [vmem:[%s3111_s6] ss:$0 sm:$0xff] }
  0x58   :  { %1958 = vmatprep.subr.bf16.mxu0 %v2063_v9 }
  0x59   :  { %1925 = vmatpush3.bf16.msra.mxu1 %v2082_v20 }
  0x5a   :  { %1926 = vmatprep.subr.bf16.mxu1 %v2083_v21 }
  0x5b   :  { %1959 = vmatpush3.bf16.msra.mxu0 %v2063_v9 }
  0x5c   :  { %1960 = vmatprep.subr.bf16.mxu0 %v2066_v10 }
  0x5d   :  { %1927 = vmatpush3.bf16.msra.mxu1 %v2083_v21 }
  0x5e   :  { %1913 = vmatmul.mubr.msk.bf16.gmra.mrb[8].mxu0 %vm156_vm0, %v2065_v11  ;;  %1928 = vmatprep.subr.bf16.mxu1 %v2084_v24 }
  0x5f   :  { %1961 = vmatpush3.bf16.msra.mxu0 %v2066_v10  ;;  %1916 = vmatprep.mubr.msk.bf16.mxu0 %vm156_vm0, %v2068_v12 }
  0x60   :  { %1962 = vmatprep.subr.bf16.mxu0 %v2067_v13 }
  0x61   :  { %1929 = vmatpush3.bf16.msra.mxu1 %v2084_v24 }
  0x62   :  { %1930 = vmatprep.subr.bf16.mxu1 %v2085_v25 }
  0x63   :  { %1963 = vmatpush3.bf16.msra.mxu0 %v2067_v13 }
  0x64   :  { %1964 = vmatprep.subr.bf16.mxu0 %v2070_v15 }
  0x65   :  { %1931 = vmatpush3.bf16.msra.mxu1 %v2085_v25 }
  0x66   :  { %1917 = vmatmul.mubr.msk.bf16.gmra.mrb[12].mxu0 %vm156_vm0, %v2069_v14  ;;  %1932 = vmatprep.subr.bf16.mxu1 %v2086_v28 }
  0x67   :  { %1965 = vmatpush3.bf16.msra.mxu0 %v2070_v15  ;;  %1968 = vmatprep.mubr.bf16.mxu0 %v2072_v18 }
  0x68   :  { %1966 = vmatprep.subr.bf16.mxu0 %v2071_v19 }
  0x69   :  { %1933 = vmatpush3.bf16.msra.mxu1 %v2086_v28 }
  0x6a   :  { %1934 = vmatprep.subr.bf16.mxu1 %v2087_v32 }
  0x6b   :  { %1967 = vmatpush3.bf16.msra.mxu0 %v2071_v19 }
  0x6d   :  { %1935 = vmatpush3.bf16.msra.mxu1 %v2087_v32 }
  0x6e   :  { %1969 = vmatmul.mubr.bf16.vlgmr.msra.gmra.mrb[16].mxu0 %v2073_v22  ;;  %1984 = vmatprep.subr.bf16.mxu1 %v2088_v33 }
  0x6f   :  { %1972 = vmatprep.mubr.bf16.mxu0 %v2074_v23 }
  0x76   :  { %1973 = vmatmul.mubr.bf16.gmra.mrb[20].mxu0 %v2075_v26 }
  0x77   :  { %1976 = vmatprep.mubr.bf16.mxu0 %v2076_v27 }
  0x7e   :  { %1977 = vmatmul.mubr.bf16.gmra.mrb[24].mxu0 %v2077_v29 }
  0x7f   :  { %1980 = vmatprep.mubr.bf16.mxu0 %v2078_v30 }
  0x86   :  { %1981 = vmatmul.mubr.bf16.gmra.mrb[28].mxu0 %v2079_v31 }
 0x121   :  { %v1906_v34 = vpop.f32.mrb[0].mxu0 }
 0x122   :  { %v215_v35 = vpop.f32.mrb[1].mxu0 }
 0x123   :  { %v1907_v36 = vpop.f32.mrb[2].mxu0 }
 0x124   :  { %v295_v37 = vpack.c.bf16 %v1907_v36, %v1906_v34  ;;  %v218_v38 = vpop.f32.mrb[3].mxu0 }
 0x125   :  { %v294_v39 = vpack.c.bf16 %v218_v38, %v215_v35 }
 0x127   :  { %1936 = vmatprep.mubr.bf16.mxu1 %v294_v39 }
 0x128   :  { %1937 = vmatmul.mubr.bf16.vlgmr.msra.gmra.mrb[0].mxu1 %v295_v37 }
 0x129   :  { %v1910_v41 = vpop.f32.mrb[4].mxu0  ;;  %1985 = vmatpush3.bf16.msra.mxu1 %v2088_v33 }
 0x12a   :  { %v231_v42 = vpop.f32.mrb[5].mxu0  ;;  %1986 = vmatprep.subr.bf16.mxu1 %v2089_v40 }
 0x12b   :  { %v1911_v44 = vpop.f32.mrb[6].mxu0 }
 0x12c   :  { %v297_v45 = vpack.c.bf16 %v1911_v44, %v1910_v41  ;;  %v234_v46 = vpop.f32.mrb[7].mxu0 }
 0x12d   :  { %v296_v47 = vpack.c.bf16 %v234_v46, %v231_v42  ;;  %1987 = vmatpush3.bf16.msra.mxu1 %v2089_v40 }
 0x12e   :  { %1988 = vmatprep.subr.bf16.mxu1 %v2090_v43 }
 0x12f   :  { %1940 = vmatprep.mubr.bf16.mxu1 %v296_v47 }
 0x130   :  { %1941 = vmatmul.mubr.bf16.gmra.mrb[4].mxu1 %v297_v45 }
 0x131   :  { %v1914_v49 = vpop.f32.mrb[8].mxu0  ;;  %1989 = vmatpush3.bf16.msra.mxu1 %v2090_v43 }
 0x132   :  { %v247_v50 = vpop.f32.mrb[9].mxu0  ;;  %1990 = vmatprep.subr.bf16.mxu1 %v2091_v48 }
 0x133   :  { %v1915_v52 = vpop.f32.mrb[10].mxu0 }
 0x134   :  { %v299_v53 = vpack.c.bf16 %v1915_v52, %v1914_v49  ;;  %v250_v54 = vpop.f32.mrb[11].mxu0 }
 0x135   :  { %v298_v55 = vpack.c.bf16 %v250_v54, %v247_v50  ;;  %1991 = vmatpush3.bf16.msra.mxu1 %v2091_v48 }
 0x136   :  { %1992 = vmatprep.subr.bf16.mxu1 %v2092_v51 }
 0x137   :  { %1944 = vmatprep.mubr.bf16.mxu1 %v298_v55 }
 0x138   :  { %1945 = vmatmul.mubr.bf16.gmra.mrb[8].mxu1 %v299_v53 }
 0x139   :  { %v1918_v57 = vpop.f32.mrb[12].mxu0  ;;  %1993 = vmatpush3.bf16.msra.mxu1 %v2092_v51 }
 0x13a   :  { %v263_v58 = vpop.f32.mrb[13].mxu0  ;;  %1994 = vmatprep.subr.bf16.mxu1 %v2093_v56 }
 0x13b   :  { %v1919_v60 = vpop.f32.mrb[14].mxu0 }
 0x13c   :  { %v301_v61 = vpack.c.bf16 %v1919_v60, %v1918_v57  ;;  %v266_v62 = vpop.f32.mrb[15].mxu0 }
 0x13d   :  { %v300_v63 = vpack.c.bf16 %v266_v62, %v263_v58  ;;  %1995 = vmatpush3.bf16.msra.mxu1 %v2093_v56 }
 0x13e   :  { %1996 = vmatprep.subr.bf16.mxu1 %v2094_v59 }
 0x13f   :  { %1948 = vmatprep.mubr.bf16.mxu1 %v300_v63 }
 0x140   :  { %1949 = vmatmul.mubr.bf16.gmra.mrb[12].mxu1 %v301_v61 }
 0x141   :  { %v1970_v2 = vpop.f32.mrb[16].mxu0  ;;  %1997 = vmatpush3.bf16.msra.mxu1 %v2094_v59 }
 0x142   :  { %v2551_v3 = vadd.f32 %v1970_v2, %v2548_v1  ;;  %v623_v4 = vpop.f32.mrb[17].mxu0  ;;  %1998 = vmatprep.subr.bf16.mxu1 %v2095_v0 }
 0x143   :  { %v2554_v5 = vadd.f32 %v2548_v1, %v623_v4  ;;  %v1971_v6 = vpop.f32.mrb[18].mxu0 }
 0x144   :  { %v704_v7 = vand.u32 2147483647, %v2551_v3  ;;  %v2558_v8 = vadd.f32 %v1971_v6, %v2548_v1  ;;  %v626_v9 = vpop.f32.mrb[19].mxu0  ;;  %v688_v56 = vmax.f32 %v2551_v3, 0.0 }
 0x145   :  { %v702_v10 = vand.u32 2147483647, %v2554_v5  ;;  %v2562_v11 = vadd.f32 %v2548_v1, %v626_v9  ;;  %1999 = vmatpush3.bf16.msra.mxu1 %v2095_v0  ;;  %v686_v57 = vmax.f32 %v2554_v5, 0.0 }
 0x146   :  { %v720_v12 = vsub.f32 0.0, %v704_v7  ;;  %v705_v13 = vand.u32 2147483647, %v2558_v8  ;;  %v689_v59 = vmax.f32 %v2558_v8, 0.0 }
 0x147   :  { %v718_v14 = vsub.f32 0.0, %v702_v10  ;;  %v703_v15 = vand.u32 2147483647, %v2562_v11  ;;  %v687_v61 = vmax.f32 %v2562_v11, 0.0 }
 0x148   :  { %v738_v16 = vmul.f32 1.442695, %v720_v12  ;;  %v721_v17 = vsub.f32 0.0, %v705_v13 }
 0x149   :  { %v734_v18 = vmul.f32 1.442695, %v718_v14  ;;  %v719_v19 = vsub.f32 0.0, %v703_v15  ;;  %v1974_v20 = vpop.f32.mrb[20].mxu0 }
 0x14a   :  { %2104 = vpow2.f32 %v738_v16  ;;  %v740_v21 = vmul.f32 1.442695, %v721_v17  ;;  %v2567_v22 = vadd.f32 %v1974_v20, %v2548_v1  ;;  %v639_v23 = vpop.f32.mrb[21].mxu0 }
 0x14b   :  { %2106 = vpow2.f32 %v734_v18  ;;  %v736_v24 = vmul.f32 1.442695, %v719_v19  ;;  %v2570_v25 = vadd.f32 %v2548_v1, %v639_v23  ;;  %v1975_v26 = vpop.f32.mrb[22].mxu0 }
 0x14c   :  { %2108 = vpow2.f32 %v740_v21  ;;  %v708_v27 = vand.u32 2147483647, %v2567_v22  ;;  %v2574_v28 = vadd.f32 %v1975_v26, %v2548_v1  ;;  %v642_v29 = vpop.f32.mrb[23].mxu0  ;;  %v692_v6 = vmax.f32 %v2567_v22, 0.0 }
 0x14d   :  { %2110 = vpow2.f32 %v736_v24  ;;  %v706_v30 = vand.u32 2147483647, %v2570_v25  ;;  %v2578_v31 = vadd.f32 %v2548_v1, %v642_v29  ;;  %v690_v7 = vmax.f32 %v2570_v25, 0.0 }
 0x14e   :  { %v724_v32 = vsub.f32 0.0, %v708_v27  ;;  %v709_v33 = vand.u32 2147483647, %v2574_v28  ;;  %v693_v14 = vmax.f32 %v2574_v28, 0.0 }
 0x14f   :  { %v722_v34 = vsub.f32 0.0, %v706_v30  ;;  %v707_v35 = vand.u32 2147483647, %v2578_v31  ;;  %v691_v19 = vmax.f32 %v2578_v31, 0.0 }
 0x150   :  { %v746_v36 = vmul.f32 1.442695, %v724_v32  ;;  %v725_v37 = vsub.f32 0.0, %v709_v33 }
 0x151   :  { %v742_v38 = vmul.f32 1.442695, %v722_v34  ;;  %v723_v39 = vsub.f32 0.0, %v707_v35  ;;  %v1978_v40 = vpop.f32.mrb[24].mxu0 }
 0x152   :  { %2112 = vpow2.f32 %v746_v36  ;;  %v748_v41 = vmul.f32 1.442695, %v725_v37  ;;  %v2583_v42 = vadd.f32 %v1978_v40, %v2548_v1  ;;  %v655_v43 = vpop.f32.mrb[25].mxu0 }
 0x153   :  { %2114 = vpow2.f32 %v742_v38  ;;  %v744_v44 = vmul.f32 1.442695, %v723_v39  ;;  %v1979_v45 = vpop.f32.mrb[26].mxu0  ;;  %v2603_v20 = vadd.f32 %v2548_v1, %v655_v43 }
 0x154   :  { %v2105_v46 = vpop.eup %2104  ;;  %2116 = vpow2.f32 %v748_v41  ;;  %v2585_v47 = vpop.f32.mrb[27].mxu0  ;;  %v712_v54 = vand.u32 2147483647, %v2583_v42  ;;  %v2612_v29 = vadd.f32 %v1979_v45, %v2548_v1 }
 0x155   :  { %v2107_v48 = vpop.eup %2106  ;;  %v784_v49 = vadd.f32 1.0, %v2105_v46  ;;  %v787_v50 = vmul.f32 -0.5, %v2105_v46  ;;  %2118 = vpow2.f32 %v744_v44  ;;  %v790_v63 = vand.u32 2147483647, %v2105_v46 }
 0x156   :  { %v2109_v51 = vpop.eup %2108  ;;  %v766_v52 = vadd.f32 1.0, %v2107_v48  ;;  %v769_v53 = vmul.f32 -0.5, %v2107_v48  ;;  %v728_v9 = vsub.f32 0.0, %v712_v54  ;;  %v772_v12 = vand.u32 2147483647, %v2107_v48 }
 0x157   :  { %v2111_v55 = vpop.eup %2110  ;;  %2120 = vlog2.f32 %v784_v49  ;;  %v793_v58 = vadd.f32 1.0, %v2109_v51  ;;  %v796_v60 = vmul.f32 -0.5, %v2109_v51  ;;  %v788_v62 = vadd.f32 1.0, %v787_v50 }
 0x158   :  { %2122 = vlog2.f32 %v766_v52  ;;  %v775_v0 = vadd.f32 1.0, %v2111_v55  ;;  %v770_v4 = vadd.f32 1.0, %v769_v53  ;;  %v778_v13 = vmul.f32 -0.5, %v2111_v55 }
 0x159   :  { %2124 = vlog2.f32 %v793_v58  ;;  %v2592_v2 = vpop.f32.mrb[28].mxu0  ;;  %v797_v17 = vadd.f32 1.0, %v796_v60  ;;  %v799_v18 = vand.u32 2147483647, %v2109_v51  ;;  %v789_v24 = vmul.f32 %v2105_v46, %v788_v62 }
 0x15a   :  { %v2596_v10 = vpop.f32.mrb[29].mxu0  ;;  %2126 = vlog2.f32 %v775_v0  ;;  %vm2607_vm1 = vcmp.lt.f32.partialorder %v790_v63, 0.0004427343  ;;  %v771_v32 = vmul.f32 %v2107_v48, %v770_v4  ;;  %v781_v33 = vand.u32 2147483647, %v2111_v55 }
 0x15b   :  { %v2599_v15 = vpop.f32.mrb[30].mxu0  ;;  %v754_v35 = vmul.f32 1.442695, %v728_v9  ;;  %vm2618_vm2 = vcmp.lt.f32.partialorder %v772_v12, 0.0004427343  ;;  %v779_v38 = vadd.f32 1.0, %v778_v13  ;;  %v798_v41 = vmul.f32 %v2109_v51, %v797_v17 }
 0x15c   :  { %v2113_v16 = vpop.eup %2112  ;;  %v2605_v21 = vpop.f32.mrb[31].mxu0  ;;  %vm2623_vm3 = vcmp.lt.f32.partialorder %v799_v18, 0.0004427343  ;;  %v710_v49 = vand.u32 2147483647, %v2603_v20 }
 0x15d   :  { %v2115_v23 = vpop.eup %2114  ;;  %v820_v27 = vadd.f32 1.0, %v2113_v16  ;;  %v823_v39 = vmul.f32 -0.5, %v2113_v16  ;;  %v826_v46 = vand.u32 2147483647, %v2113_v16  ;;  %vm2629_vm4 = vcmp.lt.f32.partialorder %v781_v33, 0.0004427343 }
 0x15e   :  { %v2614_v30 = vpop.eup %2116  ;;  %v802_v34 = vadd.f32 1.0, %v2115_v23  ;;  %v805_v44 = vmul.f32 -0.5, %v2115_v23  ;;  %v808_v51 = vand.u32 2147483647, %v2115_v23  ;;  %v780_v58 = vmul.f32 %v2111_v55, %v779_v38 }
 0x15f   :  { %v2616_v36 = vpop.eup %2118  ;;  %2128 = vlog2.f32 %v820_v27  ;;  %v829_v40 = vadd.f32 1.0, %v2614_v30  ;;  %v824_v60 = vadd.f32 1.0, %v823_v39  ;;  %v832_v62 = vmul.f32 -0.5, %v2614_v30 }
 0x160   :  { %2130 = vlog2.f32 %v802_v34  ;;  %v811_v48 = vadd.f32 1.0, %v2616_v36  ;;  %v806_v9 = vadd.f32 1.0, %v805_v44  ;;  %vm2638_vm5 = vcmp.lt.f32.partialorder %v826_v46, 0.0004427343 }
 0x161   :  { %v2121_v45 = vpop.eup %2120  ;;  %2132 = vlog2.f32 %v829_v40  ;;  %v814_v55 = vmul.f32 -0.5, %v2616_v36  ;;  %v726_v18 = vsub.f32 0.0, %v710_v49  ;;  %vm2645_vm6 = vcmp.lt.f32.partialorder %v808_v51, 0.0004427343 }
 0x162   :  { %v2123_v50 = vpop.eup %2122  ;;  %v786_v52 = vmul.f32 0.6931472, %v2121_v45  ;;  %2134 = vpow2.f32 %v754_v35  ;;  %v835_v26 = vand.u32 2147483647, %v2614_v30  ;;  %v833_v34 = vadd.f32 1.0, %v832_v62 }
 0x163   :  { %v2125_v54 = vpop.eup %2124  ;;  %2136 = vlog2.f32 %v811_v48  ;;  %v768_v0 = vmul.f32 0.6931472, %v2123_v50  ;;  %v750_v35 = vmul.f32 1.442695, %v726_v18  ;;  %v807_v40 = vmul.f32 %v2115_v23, %v806_v9 }
 0x164   :  { %v792_v63 = vsel %vm2607_vm1, %v789_v24, %v786_v52  ;;  %v795_v4 = vmul.f32 0.6931472, %v2125_v54  ;;  %v2127_v12 = vpop.eup %2126  ;;  %v815_v46 = vadd.f32 1.0, %v814_v55  ;;  %vm2659_vm7 = vcmp.lt.f32.partialorder %v835_v26, 0.0004427343 }
 0x165   :  { %v912_v13 = vadd.f32 %v792_v63, %v688_v56  ;;  %v777_v33 = vmul.f32 0.6931472, %v2127_v12  ;;  %v825_v56 = vmul.f32 %v2113_v16, %v824_v60  ;;  %v774_v38 = vsel %vm2618_vm2, %v771_v32, %v768_v0 }
 0x166   :  { %v801_v27 = vsel %vm2623_vm3, %v798_v41, %v795_v4  ;;  %v817_v41 = vand.u32 2147483647, %v2616_v36  ;;  %2138 = vpow2.f32 %v750_v35  ;;  %v713_v32 = vand.u32 2147483647, %v2612_v29 }
 0x167   :  { %v913_v3 = vadd.f32 %v801_v27, %v689_v59  ;;  %v783_v39 = vsel %vm2629_vm4, %v780_v58, %v777_v33  ;;  %v1703_v44 = vadd.f32 -0.6931472, %v912_v13  ;;  %v910_v23 = vadd.f32 %v774_v38, %v686_v57 }
 0x168   :  { %v911_v8 = vadd.f32 %v783_v39, %v687_v61  ;;  %v834_v52 = vmul.f32 %v2614_v30, %v833_v34  ;;  %vm2671_vm8 = vcmp.lt.f32.partialorder %v817_v41, 0.0004427343  ;;  %v729_v54 = vsub.f32 0.0, %v713_v32 }
 0x169   :  { %v2129_v43 = vpop.eup %2128  ;;  %v1704_v45 = vadd.f32 -0.6931472, %v913_v3  ;;  %v816_v57 = vmul.f32 %v2616_v36, %v815_v46  ;;  %v2680_v30 = vadd.f32 %v2548_v1, %v2585_v47  ;;  %v2684_v60 = vadd.f32 %v2592_v2, %v2548_v1 }
 0x16a   :  { %v2131_v48 = vpop.eup %2130  ;;  %v822_v59 = vmul.f32 0.6931472, %v2129_v43  ;;  %v1702_v62 = vadd.f32 -0.6931472, %v911_v8  ;;  %v756_v4 = vmul.f32 1.442695, %v729_v54  ;;  %v2709_v3 = vadd.f32 %v2599_v15, %v2548_v1 }
 0x16b   :  { %v2133_v37 = vpop.eup %2132  ;;  %v959_v49 = vpack.c.bf16 %v1704_v45, %v1703_v44  ;;  %v804_v50 = vmul.f32 0.6931472, %v2131_v48  ;;  %v1701_v9 = vadd.f32 -0.6931472, %v910_v23  ;;  %v711_v47 = vand.u32 2147483647, %v2680_v30 }
 0x16c   :  { %v2667_v53 = vpop.eup %2134  ;;  %v828_v11 = vsel %vm2638_vm5, %v825_v56, %v822_v59  ;;  %v831_v61 = vmul.f32 0.6931472, %v2133_v37  ;;  %2140 = vpow2.f32 %v756_v4  ;;  %v716_v18 = vand.u32 2147483647, %v2684_v60 }
 0x16d   :  { %v2137_v58 = vpop.eup %2136  ;;  %v916_v5 = vadd.f32 %v828_v11, %v692_v6  ;;  %v810_v22 = vsel %vm2645_vm6, %v807_v40, %v804_v50  ;;  %v856_v12 = vadd.f32 1.0, %v2667_v53  ;;  %v727_v55 = vsub.f32 0.0, %v711_v47 }
 0x16e   :  { %v837_v63 = vsel %vm2659_vm7, %v834_v52, %v831_v61  ;;  %v813_v0 = vmul.f32 0.6931472, %v2137_v58  ;;  %v914_v28 = vadd.f32 %v810_v22, %v690_v7  ;;  %v958_v27 = vpack.c.bf16 %v1702_v62, %v1701_v9 }
 0x16f   :  { %v917_v6 = vadd.f32 %v837_v63, %v693_v14  ;;  %v1707_v36 = vadd.f32 -0.6931472, %v916_v5  ;;  %v2703_v14 = vadd.f32 %v2548_v1, %v2596_v10  ;;  %v752_v24 = vmul.f32 1.442695, %v727_v55 }
 0x170   :  { %v819_v2 = vsel %vm2671_vm8, %v816_v57, %v813_v0  ;;  %v2705_v33 = vpop.eup %2138  ;;  %v732_v26 = vsub.f32 0.0, %v716_v18  ;;  %2142 = vlog2.f32 %v856_v12  ;;  %2000 = vmatprep.mubr.bf16.mxu1 %v958_v27  ;;  %v1705_v34 = vadd.f32 -0.6931472, %v914_v28 }
 0x171   :  { %v1708_v13 = vadd.f32 -0.6931472, %v917_v6  ;;  %v915_v17 = vadd.f32 %v819_v2, %v691_v19  ;;  %v2713_v19 = vadd.f32 %v2548_v1, %v2605_v21  ;;  %2144 = vpow2.f32 %v752_v24  ;;  %2001 = vmatmul.mubr.bf16.vlgmr.msra.gmra.mrb[16].mxu1 %v959_v49 }
 0x172   :  { %v762_v7 = vmul.f32 1.442695, %v732_v26  ;;  %v714_v10 = vand.u32 2147483647, %v2703_v14  ;;  %v838_v56 = vadd.f32 1.0, %v2705_v33  ;;  %v859_v43 = vmul.f32 -0.5, %v2667_v53 }
 0x173   :  { %v961_v31 = vpack.c.bf16 %v1708_v13, %v1707_v36  ;;  %v1706_v25 = vadd.f32 -0.6931472, %v915_v17  ;;  %v717_v15 = vand.u32 2147483647, %v2709_v3  ;;  %v715_v38 = vand.u32 2147483647, %v2713_v19 }
 0x174   :  { %2146 = vpow2.f32 %v762_v7  ;;  %v730_v35 = vsub.f32 0.0, %v714_v10  ;;  %v860_v59 = vadd.f32 1.0, %v859_v43  ;;  %v862_v16 = vand.u32 2147483647, %v2667_v53 }
 0x175   :  { %v733_v40 = vsub.f32 0.0, %v717_v15  ;;  %v960_v1 = vpack.c.bf16 %v1706_v25, %v1705_v34  ;;  %2148 = vlog2.f32 %v838_v56  ;;  %v731_v41 = vsub.f32 0.0, %v715_v38 }
 0x176   :  { %v758_v39 = vmul.f32 1.442695, %v730_v35  ;;  %v2141_v21 = vpop.eup %2140  ;;  %v841_v50 = vmul.f32 -0.5, %v2705_v33  ;;  %v861_v11 = vmul.f32 %v2667_v53, %v860_v59  ;;  %v844_v61 = vand.u32 2147483647, %v2705_v33 }
 0x177   :  { %v865_v44 = vadd.f32 1.0, %v2141_v21  ;;  %2004 = vmatprep.mubr.bf16.mxu1 %v960_v1  ;;  %v764_v45 = vmul.f32 1.442695, %v733_v40  ;;  %v760_v46 = vmul.f32 1.442695, %v731_v41  ;;  %v868_v32 = vmul.f32 -0.5, %v2141_v21 }
 0x178   :  { %2150 = vpow2.f32 %v758_v39  ;;  %vm863_vm9 = vcmp.lt.f32.partialorder %v862_v16, 0.0004427343  ;;  %v842_v57 = vadd.f32 1.0, %v841_v50  ;;  %v871_v62 = vand.u32 2147483647, %v2141_v21 }
 0x179   :  { %2152 = vlog2.f32 %v865_v44  ;;  %2005 = vmatmul.mubr.bf16.gmra.mrb[20].mxu1 %v961_v31  ;;  %v869_v54 = vadd.f32 1.0, %v868_v32  ;;  %v696_v0 = vmax.f32 %v2583_v42, 0.0  ;;  %vm2728_vm10 = vcmp.lt.f32.partialorder %v844_v61, 0.0004427343 }
 0x17a   :  { %v2143_v48 = vpop.eup %2142  ;;  %2154 = vpow2.f32 %v764_v45  ;;  %v697_v53 = vmax.f32 %v2612_v29, 0.0  ;;  %v843_v17 = vmul.f32 %v2705_v33, %v842_v57  ;;  %vm872_vm11 = vcmp.lt.f32.partialorder %v871_v62, 0.0004427343 }
 0x17b   :  { %v2145_v8 = vpop.eup %2144  ;;  %2156 = vpow2.f32 %v760_v46  ;;  %v858_v49 = vmul.f32 0.6931472, %v2143_v48  ;;  %v870_v12 = vmul.f32 %v2141_v21, %v869_v54  ;;  %v694_v33 = vmax.f32 %v2603_v20, 0.0 }
 0x17c   :  { %v847_v37 = vadd.f32 1.0, %v2145_v8  ;;  %v850_v63 = vmul.f32 -0.5, %v2145_v8  ;;  %v853_v28 = vand.u32 2147483647, %v2145_v8  ;;  %v695_v10 = vmax.f32 %v2680_v30, 0.0 }
 0x17d   :  { %v864_v5 = vsel %vm863_vm9, %v861_v11, %v858_v49  ;;  %v700_v57 = vmax.f32 %v2684_v60, 0.0  ;;  %v698_v62 = vmax.f32 %v2703_v14, 0.0 }
 0x17e   :  { %v2721_v23 = vpop.eup %2146  ;;  %2158 = vlog2.f32 %v847_v37  ;;  %v920_v36 = vadd.f32 %v864_v5, %v696_v0  ;;  %v851_v42 = vadd.f32 1.0, %v850_v63  ;;  %vm854_vm12 = vcmp.lt.f32.partialorder %v853_v28, 0.0004427343  ;;  %v2096_v28 = vld [vmem:[#allocation8] sm:$0xff]  }
 0x17f   :  { %v892_v52 = vadd.f32 1.0, %v2721_v23  ;;  %v2149_v51 = vpop.eup %2148  ;;  %v895_v27 = vmul.f32 -0.5, %v2721_v23  ;;  %v898_v15 = vand.u32 2147483647, %v2721_v23  ;;  %v701_v63 = vmax.f32 %v2709_v3, 0.0  ;;  %2016 = vmatprep.subr.bf16.mxu0 %v2096_v28 }
 0x180   :  { %v840_v22 = vmul.f32 0.6931472, %v2149_v51  ;;  %v1711_v7 = vadd.f32 -0.6931472, %v920_v36  ;;  %v852_v35 = vmul.f32 %v2145_v8, %v851_v42  ;;  %v699_v36 = vmax.f32 %v2713_v19, 0.0  ;;  %2017 = vmatpush3.bf16.msra.mxu0 %v2096_v28 }
 0x181   :  { %2160 = vlog2.f32 %v892_v52  ;;  %v896_v40 = vadd.f32 1.0, %v895_v27  ;;  %vm2748_vm13 = vcmp.lt.f32.partialorder %v898_v15, 0.0004427343  ;;  %v2098_v27 = vld [vmem:[#allocation8 + $0x10] sm:$0xff]   ;;  %v2841_v28 = vld [vmem:[%s3109_s4] ss:$0 sm:$0xff] }
 0x182   :  { %v2151_v58 = vpop.eup %2150  ;;  %v846_v24 = vsel %vm2728_vm10, %v843_v17, %v840_v22  ;;  %v2102_v15 = vld [vmem:[#allocation8 + $0x30] sm:$0xff]   ;;  %s2356_s4 = smov [#allocation10]  }
 0x183   :  { %v874_v4 = vadd.f32 1.0, %v2151_v58  ;;  %v2153_v9 = vpop.eup %2152  ;;  %v877_v31 = vmul.f32 -0.5, %v2151_v58  ;;  %v918_v39 = vadd.f32 %v846_v24, %v694_v33  ;;  %v880_v30 = vand.u32 2147483647, %v2151_v58  ;;  %s1644_s13 = sshll.u32 %s2356_s4, 4  ;;  %s1645_s13 = int_to_ptr.vmem [resolvable:$true] %s1644_s13 }
 0x184   :  { %v2733_v47 = vpop.eup %2154  ;;  %v867_v2 = vmul.f32 0.6931472, %v2153_v9  ;;  %v897_v16 = vmul.f32 %v2721_v23, %v896_v40  ;;  %s2320_s15 = scalar_lea.vmem %s1645_s13, 1024  ;;  %p2325_p5 = scmp.lt.s32.totalorder %s1645_s13, %s1645_s13 }
 0x185   :  { %2162 = vlog2.f32 %v874_v4  ;;  %v2735_v13 = vpop.eup %2156  ;;  %v901_v55 = vadd.f32 1.0, %v2733_v47  ;;  %v904_v1 = vmul.f32 -0.5, %v2733_v47  ;;  %v878_v41 = vadd.f32 1.0, %v877_v31  ;;  %v2099_v31 = vld [vmem:[#allocation8 + $0x18] sm:$0xff]   ;;  %p2321_p4 = scmp.ne.s32.totalorder %s1645_s13, %s2320_s15  ;;  %p2326_p6 = scmp.lt.s32.totalorder %s2320_s15, %s2320_s15 }
 0x186   :  { %v873_v18 = vsel %vm872_vm11, %v870_v12, %v867_v2  ;;  %v883_v29 = vadd.f32 1.0, %v2735_v13  ;;  %v886_v43 = vmul.f32 -0.5, %v2735_v13  ;;  %v1709_v8 = vadd.f32 -0.6931472, %v918_v39 }
 0x187   :  { %v921_v26 = vadd.f32 %v873_v18, %v697_v53  ;;  %2164 = vlog2.f32 %v901_v55  ;;  %v905_v32 = vadd.f32 1.0, %v904_v1  ;;  %v879_v49 = vmul.f32 %v2151_v58, %v878_v41  ;;  %v2103_v1 = vld [vmem:[#allocation8 + $0x38] sm:$0xff]   ;;  %p2327_p7 = por %p2326_p6, %p2325_p5 }
 0x188   :  { %v2159_v25 = vpop.eup %2158  ;;  %2166 = vlog2.f32 %v883_v29  ;;  %v907_v50 = vand.u32 2147483647, %v2733_v47  ;;  %v887_v52 = vadd.f32 1.0, %v886_v43  ;;  %vm2756_vm14 = vcmp.lt.f32.partialorder %v880_v30, 0.0004427343 }
 0x189   :  { %v1712_v56 = vadd.f32 -0.6931472, %v921_v26  ;;  %v849_v34 = vmul.f32 0.6931472, %v2159_v25  ;;  %v889_v51 = vand.u32 2147483647, %v2735_v13  ;;  %v906_v4 = vmul.f32 %v2733_v47, %v905_v32  ;;  %p2328_p8 = pnand %p2327_p7, %p2321_p4 }
 0x18a   :  { %vm908_vm15 = vcmp.lt.f32.partialorder %v907_v50, 0.0004427343  ;;  %v888_v6 = vmul.f32 %v2735_v13, %v887_v52  ;;  %v2097_v13 = vld [vmem:[#allocation8 + $0x8] sm:$0xff]  }
 0x18b   :  { %v2161_v38 = vpop.eup %2160  ;;  %v855_v21 = vsel %vm854_vm12, %v852_v35, %v849_v34  ;;  %v963_v44 = vpack.c.bf16 %v1712_v56, %v1711_v7  ;;  %vm890_vm0 = vcmp.lt.f32.partialorder %v889_v51, 0.0004427343  ;;  %2018 = vmatprep.subr.bf16.mxu0 %v2097_v13  ;;  %v2100_v7 = vld [vmem:[#allocation8 + $0x20] sm:$0xff]   ;;  %v2101_v34 = vld [vmem:[#allocation8 + $0x28] sm:$0xff]  }
 0x18c   :  { %v919_v20 = vadd.f32 %v855_v21, %v695_v10  ;;  %v894_v45 = vmul.f32 0.6931472, %v2161_v38  ;;  %2019 = vmatpush3.bf16.msra.mxu0 %v2097_v13 }
 0x18d   :  { %2020 = vmatprep.subr.bf16.mxu0 %v2098_v27 }
 0x18e   :  { %v1710_v59 = vadd.f32 -0.6931472, %v919_v20  ;;  %v900_v11 = vsel %vm2748_vm13, %v897_v16, %v894_v45  ;;  %v2804_v20 = vld [vmem:[%s3113_s8] ss:$0 sm:$0xff] }
 0x18f   :  { %v2163_v48 = vpop.eup %2162  ;;  %v924_v9 = vadd.f32 %v900_v11, %v700_v57 }
 0x190   :  { %v876_v37 = vmul.f32 0.6931472, %v2163_v48  ;;  %v962_v54 = vpack.c.bf16 %v1710_v59, %v1709_v8  ;;  %2021 = vmatpush3.bf16.msra.mxu0 %v2098_v27 }
 0x191   :  { %v2165_v5 = vpop.eup %2164  ;;  %v1715_v17 = vadd.f32 -0.6931472, %v924_v9  ;;  %2022 = vmatprep.subr.bf16.mxu0 %v2099_v31 }
 0x192   :  { %v882_v23 = vsel %vm2756_vm14, %v879_v49, %v876_v37  ;;  %v2167_v58 = vpop.eup %2166  ;;  %v903_v0 = vmul.f32 0.6931472, %v2165_v5  ;;  %2008 = vmatprep.mubr.bf16.mxu1 %v962_v54 }
 0x193   :  { %v885_v22 = vmul.f32 0.6931472, %v2167_v58  ;;  %2009 = vmatmul.mubr.bf16.gmra.mrb[24].mxu1 %v963_v44  ;;  %v922_v53 = vadd.f32 %v882_v23, %v698_v62 }
 0x194   :  { %v909_v60 = vsel %vm908_vm15, %v906_v4, %v903_v0  ;;  %2023 = vmatpush3.bf16.msra.mxu0 %v2099_v31 }
 0x195   :  { %v925_v2 = vadd.f32 %v909_v60, %v701_v63  ;;  %v891_v12 = vsel %vm890_vm0, %v888_v6, %v885_v22  ;;  %v1713_v42 = vadd.f32 -0.6931472, %v922_v53  ;;  %2024 = vmatprep.subr.bf16.mxu0 %v2100_v7 }
 0x196   :  { %v923_v14 = vadd.f32 %v891_v12, %v699_v36 }
 0x197   :  { %v1716_v3 = vadd.f32 -0.6931472, %v925_v2 }
 0x198   :  { %v1714_v55 = vadd.f32 -0.6931472, %v923_v14  ;;  %2025 = vmatpush3.bf16.msra.mxu0 %v2100_v7 }
 0x199   :  { %v965_v47 = vpack.c.bf16 %v1716_v3, %v1715_v17  ;;  %2026 = vmatprep.subr.bf16.mxu0 %v2101_v34 }
 0x19a   :  { %v964_v18 = vpack.c.bf16 %v1714_v55, %v1713_v42 }
 0x19c   :  { %2012 = vmatprep.mubr.bf16.mxu1 %v964_v18  ;;  %2027 = vmatpush3.bf16.msra.mxu0 %v2101_v34 }
 0x19d   :  { %2013 = vmatmul.mubr.bf16.gmra.mrb[28].mxu1 %v965_v47  ;;  %2028 = vmatprep.subr.bf16.mxu0 %v2102_v15 }
 0x1a0   :  { %2029 = vmatpush3.bf16.msra.mxu0 %v2102_v15 }
 0x1a1   :  { %2030 = vmatprep.subr.bf16.mxu0 %v2103_v1 }
 0x1a4   :  { %2031 = vmatpush3.bf16.msra.mxu0 %v2103_v1 }
 0x1fb   :  { %v2769_v19 = vpop.f32.mrb[0].mxu1 }
 0x1fc   :  { %v2771_v29 = vpop.f32.mrb[1].mxu1  ;;  %v2845_v15 = vadd.f32 %v2769_v19, %v2841_v28 }
 0x1fd   :  { %v2773_v24 = vpop.f32.mrb[2].mxu1 }
 0x1fe   :  { %v2775_v26 = vpop.f32.mrb[3].mxu1 }
 0x203   :  { %v2777_v25 = vpop.f32.mrb[4].mxu1 }
 0x204   :  { %v2779_v33 = vpop.f32.mrb[5].mxu1  ;;  %v2861_v19 = vadd.f32 %v2777_v25, %v2841_v28 }
 0x205   :  { %v2781_v10 = vpop.f32.mrb[6].mxu1 }
 0x206   :  { %v2783_v56 = vpop.f32.mrb[7].mxu1 }
 0x20b   :  { %v2785_v35 = vpop.f32.mrb[8].mxu1 }
 0x20c   :  { %v2787_v38 = vpop.f32.mrb[9].mxu1 }
 0x20d   :  { %v2789_v39 = vpop.f32.mrb[10].mxu1 }
 0x20e   :  { %v2791_v40 = vpop.f32.mrb[11].mxu1 }
 0x213   :  { %v2793_v21 = vpop.f32.mrb[12].mxu1 }
 0x214   :  { %v2795_v41 = vpop.f32.mrb[13].mxu1 }
 0x215   :  { %v2797_v43 = vpop.f32.mrb[14].mxu1 }
 0x216   :  { %v2799_v44 = vpop.f32.mrb[15].mxu1 }
 0x244   :  { %v2002_v45 = vpop.f32.mrb[16].mxu1 }
 0x245   :  { %v2807_v30 = vadd.f32 %v2002_v45, %v2804_v20  ;;  %v1055_v46 = vpop.f32.mrb[17].mxu1 }
 0x246   :  { %v2810_v48 = vadd.f32 %v2804_v20, %v1055_v46  ;;  %v2003_v8 = vpop.f32.mrb[18].mxu1  ;;  %v2849_v46 = vadd.f32 %v2841_v28, %v2771_v29 }
 0x247   :  { %v1136_v59 = vand.u32 2147483647, %v2807_v30  ;;  %v2814_v16 = vadd.f32 %v2003_v8, %v2804_v20  ;;  %v1058_v32 = vpop.f32.mrb[19].mxu1  ;;  %v2853_v8 = vadd.f32 %v2773_v24, %v2841_v28 }
 0x248   :  { %v1134_v37 = vand.u32 2147483647, %v2810_v48  ;;  %v2818_v49 = vadd.f32 %v2804_v20, %v1058_v32  ;;  %v2857_v32 = vadd.f32 %v2841_v28, %v2775_v26  ;;  %v1118_v24 = vmax.f32 %v2810_v48, 0.0 }
 0x249   :  { %v1152_v50 = vsub.f32 0.0, %v1136_v59  ;;  %v1137_v52 = vand.u32 2147483647, %v2814_v16 }
 0x24a   :  { %v1150_v11 = vsub.f32 0.0, %v1134_v37  ;;  %v1135_v61 = vand.u32 2147483647, %v2818_v49  ;;  %v1119_v26 = vmax.f32 %v2818_v49, 0.0 }
 0x24b   :  { %v1170_v51 = vmul.f32 1.442695, %v1152_v50  ;;  %v1153_v54 = vsub.f32 0.0, %v1137_v52  ;;  %v1120_v50 = vmax.f32 %v2807_v30, 0.0 }
 0x24c   :  { %v1166_v5 = vmul.f32 1.442695, %v1150_v11  ;;  %v1151_v57 = vsub.f32 0.0, %v1135_v61  ;;  %v2006_v23 = vpop.f32.mrb[20].mxu1  ;;  %v1121_v61 = vmax.f32 %v2814_v16, 0.0 }
 0x24d   :  { %2168 = vpow2.f32 %v1170_v51  ;;  %v1172_v58 = vmul.f32 1.442695, %v1153_v54  ;;  %v2823_v62 = vadd.f32 %v2006_v23, %v2804_v20  ;;  %v1071_v63 = vpop.f32.mrb[21].mxu1 }
 0x24e   :  { %2170 = vpow2.f32 %v1166_v5  ;;  %v1168_v0 = vmul.f32 1.442695, %v1151_v57  ;;  %v2826_v4 = vadd.f32 %v2804_v20, %v1071_v63  ;;  %v2007_v9 = vpop.f32.mrb[22].mxu1 }
 0x24f   :  { %2172 = vpow2.f32 %v1172_v58  ;;  %v1140_v22 = vand.u32 2147483647, %v2823_v62  ;;  %v2830_v6 = vadd.f32 %v2007_v9, %v2804_v20  ;;  %v1074_v53 = vpop.f32.mrb[23].mxu1  ;;  %v1124_v25 = vmax.f32 %v2823_v62, 0.0 }
 0x250   :  { %2174 = vpow2.f32 %v1168_v0  ;;  %v1138_v60 = vand.u32 2147483647, %v2826_v4  ;;  %v2834_v36 = vadd.f32 %v2804_v20, %v1074_v53  ;;  %v1122_v30 = vmax.f32 %v2826_v4, 0.0 }
 0x251   :  { %v1156_v2 = vsub.f32 0.0, %v1140_v22  ;;  %v1141_v12 = vand.u32 2147483647, %v2830_v6 }
 0x252   :  { %v1154_v14 = vsub.f32 0.0, %v1138_v60  ;;  %v1139_v17 = vand.u32 2147483647, %v2834_v36 }
 0x253   :  { %v1178_v3 = vmul.f32 1.442695, %v1156_v2  ;;  %v1157_v42 = vsub.f32 0.0, %v1141_v12 }
 0x254   :  { %v1174_v55 = vmul.f32 1.442695, %v1154_v14  ;;  %v1155_v47 = vsub.f32 0.0, %v1139_v17 }
 0x255   :  { %2176 = vpow2.f32 %v1178_v3  ;;  %v1180_v18 = vmul.f32 1.442695, %v1157_v42 }
 0x256   :  { %2178 = vpow2.f32 %v1174_v55  ;;  %v1176_v13 = vmul.f32 1.442695, %v1155_v47 }
 0x257   :  { %v2169_v27 = vpop.eup %2168  ;;  %2180 = vpow2.f32 %v1180_v18 }
 0x258   :  { %v2171_v31 = vpop.eup %2170  ;;  %v1216_v7 = vadd.f32 1.0, %v2169_v27  ;;  %2182 = vpow2.f32 %v1176_v13  ;;  %v1219_v37 = vmul.f32 -0.5, %v2169_v27  ;;  %v1222_v29 = vand.u32 2147483647, %v2169_v27 }
 0x259   :  { %v2173_v34 = vpop.eup %2172  ;;  %v1198_v1 = vadd.f32 1.0, %v2171_v31  ;;  %v1201_v11 = vmul.f32 -0.5, %v2171_v31  ;;  %v1204_v23 = vand.u32 2147483647, %v2171_v31 }
 0x25a   :  { %v2175_v45 = vpop.eup %2174  ;;  %2184 = vlog2.f32 %v1216_v7  ;;  %v1225_v59 = vadd.f32 1.0, %v2173_v34  ;;  %v1228_v51 = vmul.f32 -0.5, %v2173_v34  ;;  %v1220_v57 = vadd.f32 1.0, %v1219_v37 }
 0x25b   :  { %2186 = vlog2.f32 %v1198_v1  ;;  %v1207_v52 = vadd.f32 1.0, %v2175_v45  ;;  %v1210_v54 = vmul.f32 -0.5, %v2175_v45  ;;  %v1231_v58 = vand.u32 2147483647, %v2173_v34 }
 0x25c   :  { %2188 = vlog2.f32 %v1225_v59  ;;  %vm2871_vm1 = vcmp.lt.f32.partialorder %v1222_v29, 0.0004427343  ;;  %v1202_v2 = vadd.f32 1.0, %v1201_v11  ;;  %v1229_v12 = vadd.f32 1.0, %v1228_v51 }
 0x25d   :  { %2190 = vlog2.f32 %v1207_v52  ;;  %v1211_v42 = vadd.f32 1.0, %v1210_v54  ;;  %v1213_v55 = vand.u32 2147483647, %v2175_v45  ;;  %v1221_v18 = vmul.f32 %v2169_v27, %v1220_v57 }
 0x25e   :  { %vm2883_vm2 = vcmp.lt.f32.partialorder %v1204_v23, 0.0004427343  ;;  %vm2887_vm3 = vcmp.lt.f32.partialorder %v1231_v58, 0.0004427343  ;;  %v1203_v51 = vmul.f32 %v2171_v31, %v1202_v2  ;;  %v1230_v23 = vmul.f32 %v2173_v34, %v1229_v12 }
 0x25f   :  { %v2177_v5 = vpop.eup %2176  ;;  %v1212_v58 = vmul.f32 %v2175_v45, %v1211_v42  ;;  %vm2894_vm4 = vcmp.lt.f32.partialorder %v1213_v55, 0.0004427343 }
 0x260   :  { %v2869_v63 = vpop.eup %2178  ;;  %v1252_v9 = vadd.f32 1.0, %v2177_v5  ;;  %v1255_v14 = vmul.f32 -0.5, %v2177_v5  ;;  %v1258_v59 = vand.u32 2147483647, %v2177_v5 }
 0x261   :  { %v2877_v60 = vpop.eup %2180  ;;  %v1234_v17 = vadd.f32 1.0, %v2869_v63  ;;  %v1237_v37 = vmul.f32 -0.5, %v2869_v63  ;;  %v1240_v54 = vand.u32 2147483647, %v2869_v63 }
 0x262   :  { %v2880_v3 = vpop.eup %2182  ;;  %2192 = vlog2.f32 %v1252_v9  ;;  %v1261_v47 = vadd.f32 1.0, %v2877_v60  ;;  %v1256_v27 = vadd.f32 1.0, %v1255_v14  ;;  %v1264_v53 = vmul.f32 -0.5, %v2877_v60 }
 0x263   :  { %2194 = vlog2.f32 %v1234_v17  ;;  %v1243_v29 = vadd.f32 1.0, %v2880_v3  ;;  %vm2901_vm5 = vcmp.lt.f32.partialorder %v1258_v59, 0.0004427343  ;;  %v1238_v34 = vadd.f32 1.0, %v1237_v37 }
 0x264   :  { %v2185_v1 = vpop.eup %2184  ;;  %2196 = vlog2.f32 %v1261_v47  ;;  %v1267_v45 = vand.u32 2147483647, %v2877_v60  ;;  %vm2911_vm6 = vcmp.lt.f32.partialorder %v1240_v54, 0.0004427343 }
 0x265   :  { %v2187_v52 = vpop.eup %2186  ;;  %v1218_v11 = vmul.f32 0.6931472, %v2185_v1  ;;  %2198 = vlog2.f32 %v1243_v29 }
 0x266   :  { %v2189_v57 = vpop.eup %2188  ;;  %v1200_v47 = vmul.f32 0.6931472, %v2187_v52  ;;  %v2010_v1 = vpop.f32.mrb[24].mxu1  ;;  %v1246_v52 = vmul.f32 -0.5, %v2880_v3  ;;  %vm2932_vm7 = vcmp.lt.f32.partialorder %v1267_v45, 0.0004427343 }
 0x267   :  { %v1224_v17 = vsel %vm2871_vm1, %v1221_v18, %v1218_v11  ;;  %v1227_v22 = vmul.f32 0.6931472, %v2189_v57  ;;  %v2191_v31 = vpop.eup %2190  ;;  %v2907_v12 = vadd.f32 %v2010_v1, %v2804_v20  ;;  %v1087_v42 = vpop.f32.mrb[25].mxu1  ;;  %v1257_v18 = vmul.f32 %v2177_v5, %v1256_v27 }
 0x268   :  { %v1344_v2 = vadd.f32 %v1224_v17, %v1120_v50  ;;  %v1209_v55 = vmul.f32 0.6931472, %v2191_v31  ;;  %v2011_v50 = vpop.f32.mrb[26].mxu1  ;;  %v1206_v7 = vsel %vm2883_vm2, %v1203_v51, %v1200_v47  ;;  %v2922_v5 = vadd.f32 %v2804_v20, %v1087_v42 }
 0x269   :  { %v1233_v0 = vsel %vm2887_vm3, %v1230_v23, %v1227_v22  ;;  %v1144_v11 = vand.u32 2147483647, %v2907_v12  ;;  %v1090_v57 = vpop.f32.mrb[27].mxu1  ;;  %v1265_v22 = vadd.f32 1.0, %v1264_v53  ;;  %v2925_v27 = vadd.f32 %v2011_v50, %v2804_v20 }
 0x26a   :  { %v1728_v59 = vadd.f32 -0.6931472, %v1344_v2  ;;  %v1345_v37 = vadd.f32 %v1233_v0, %v1121_v61  ;;  %v1215_v61 = vsel %vm2894_vm4, %v1212_v58, %v1209_v55  ;;  %v1239_v47 = vmul.f32 %v2869_v63, %v1238_v34 }
 0x26b   :  { %v1160_v13 = vsub.f32 0.0, %v1144_v11  ;;  %v1249_v1 = vand.u32 2147483647, %v2880_v3  ;;  %v1142_v31 = vand.u32 2147483647, %v2922_v5  ;;  %v1247_v9 = vadd.f32 1.0, %v1246_v52 }
 0x26c   :  { %v2193_v54 = vpop.eup %2192  ;;  %v2928_v23 = vmul.f32 %v1728_v59, %v2845_v15  ;;  %v1729_v16 = vadd.f32 -0.6931472, %v1345_v37  ;;  %v1342_v45 = vadd.f32 %v1206_v7, %v1118_v24  ;;  %v1343_v0 = vadd.f32 %v1215_v61, %v1119_v26 }
 0x26d   :  { %v2195_v53 = vpop.eup %2194  ;;  %v1254_v51 = vmul.f32 0.6931472, %v2193_v54  ;;  %v1186_v58 = vmul.f32 1.442695, %v1160_v13  ;;  %v1158_v55 = vsub.f32 0.0, %v1142_v31  ;;  %v1266_v24 = vmul.f32 %v2877_v60, %v1265_v22 }
 0x26e   :  { %v2197_v2 = vpop.eup %2196  ;;  %v2940_v15 = vmul.f32 %v1729_v16, %v2853_v8  ;;  %v1236_v42 = vmul.f32 0.6931472, %v2195_v53  ;;  %v1145_v63 = vand.u32 2147483647, %v2925_v27  ;;  %v1248_v7 = vmul.f32 %v2880_v3, %v1247_v9 }
 0x26f   :  { %v2199_v34 = vpop.eup %2198  ;;  %v1263_v59 = vmul.f32 0.6931472, %v2197_v2  ;;  %2200 = vpow2.f32 %v1186_v58  ;;  %v1260_v48 = vsel %vm2901_vm5, %v1257_v18, %v1254_v51  ;;  %v1182_v26 = vmul.f32 1.442695, %v1158_v55 }
 0x270   :  { %v1407_v50 = vpack.c.bf16 %v2940_v15, %v2928_v23  ;;  %v1242_v8 = vsel %vm2911_vm6, %v1239_v47, %v1236_v42  ;;  %v2014_v37 = vpop.f32.mrb[28].mxu1  ;;  %v1245_v49 = vmul.f32 0.6931472, %v2199_v34  ;;  %v1161_v54 = vsub.f32 0.0, %v1145_v63 }
 0x271   :  { %v1103_v52 = vpop.f32.mrb[29].mxu1  ;;  %v1346_v11 = vadd.f32 %v1242_v8, %v1122_v30  ;;  %v2958_v29 = vadd.f32 %v2804_v20, %v1090_v57  ;;  %v1726_v61 = vadd.f32 -0.6931472, %v1342_v45  ;;  %vm2960_vm8 = vcmp.lt.f32.partialorder %v1249_v1, 0.0004427343 }
 0x272   :  { %v2015_v16 = vpop.f32.mrb[30].mxu1  ;;  %2202 = vpow2.f32 %v1182_v26  ;;  %v2965_v60 = vadd.f32 %v2014_v37, %v2804_v20  ;;  %v1727_v18 = vadd.f32 -0.6931472, %v1343_v0  ;;  %v1348_v4 = vadd.f32 %v1260_v48, %v1124_v25 }
 0x273   :  { %v1106_v14 = vpop.f32.mrb[31].mxu1  ;;  %v1251_v30 = vsel %vm2960_vm8, %v1248_v7, %v1245_v49  ;;  %v1188_v3 = vmul.f32 1.442695, %v1161_v54  ;;  %v1269_v57 = vsel %vm2932_vm7, %v1266_v24, %v1263_v59  ;;  %v1143_v22 = vand.u32 2147483647, %v2958_v29 }
 0x274   :  { %v1148_v53 = vand.u32 2147483647, %v2965_v60  ;;  %v2976_v51 = vadd.f32 %v2804_v20, %v1103_v52  ;;  %v1730_v47 = vadd.f32 -0.6931472, %v1346_v11  ;;  %v2979_v1 = vadd.f32 %v2015_v16, %v2804_v20 }
 0x275   :  { %2204 = vpow2.f32 %v1188_v3  ;;  %v2982_v62 = vadd.f32 %v2804_v20, %v1106_v14  ;;  %v3154_v25 = vmax.f32 %v2834_v36, 0.0  ;;  %v1159_v17 = vsub.f32 0.0, %v1143_v22 }
 0x276   :  { %v1164_v2 = vsub.f32 0.0, %v1148_v53  ;;  %v1146_v42 = vand.u32 2147483647, %v2976_v51  ;;  %v408_v9 = vadd.f32 %v2841_v28, %v2779_v33  ;;  %v3155_v58 = vmax.f32 %v2830_v6, 0.0 }
 0x277   :  { %v1347_v31 = vadd.f32 %v1251_v30, %v3154_v25  ;;  %v1149_v0 = vand.u32 2147483647, %v2979_v1  ;;  %v1147_v55 = vand.u32 2147483647, %v2982_v62  ;;  %v1184_v63 = vmul.f32 1.442695, %v1159_v17 }
 0x278   :  { %v1349_v45 = vadd.f32 %v1269_v57, %v3155_v58  ;;  %v1194_v20 = vmul.f32 1.442695, %v1164_v2  ;;  %v1162_v34 = vsub.f32 0.0, %v1146_v42  ;;  %v1374_v36 = vmul.f32 %v1726_v61, %v2849_v46 }
 0x279   :  { %v2201_v8 = vpop.eup %2200  ;;  %v1165_v59 = vsub.f32 0.0, %v1149_v0  ;;  %v1163_v37 = vsub.f32 0.0, %v1147_v55  ;;  %v1375_v48 = vmul.f32 %v1727_v18, %v2857_v32  ;;  %v1378_v24 = vmul.f32 %v1730_v47, %v408_v9 }
 0x27a   :  { %v1732_v49 = vadd.f32 -0.6931472, %v1348_v4  ;;  %v1731_v33 = vadd.f32 -0.6931472, %v1347_v31  ;;  %v1288_v26 = vadd.f32 1.0, %v2201_v8  ;;  %2206 = vpow2.f32 %v1184_v63 }
 0x27b   :  { %v1733_v6 = vadd.f32 -0.6931472, %v1349_v45  ;;  %2208 = vpow2.f32 %v1194_v20  ;;  %v1190_v52 = vmul.f32 1.442695, %v1162_v34  ;;  %v1196_v11 = vmul.f32 1.442695, %v1165_v59 }
 0x27c   :  { %v2995_v7 = vpop.eup %2202  ;;  %v411_v54 = vadd.f32 %v2841_v28, %v2783_v56  ;;  %2210 = vlog2.f32 %v1288_v26  ;;  %v1192_v46 = vmul.f32 1.442695, %v1163_v37  ;;  %v1406_v16 = vpack.c.bf16 %v1375_v48, %v1374_v36 }
 0x27d   :  { %v419_v32 = vadd.f32 %v2781_v10, %v2841_v28  ;;  %v1270_v61 = vadd.f32 1.0, %v2995_v7  ;;  %2212 = vpow2.f32 %v1190_v52  ;;  %v1380_v14 = vmul.f32 %v1732_v49, %v2861_v19 }
 0x27e   :  { %2214 = vpow2.f32 %v1196_v11  ;;  %2032 = vmatprep.mubr.bf16.mxu0 %v1406_v16  ;;  %v1379_v13 = vmul.f32 %v1731_v33, %v411_v54  ;;  %v1291_v4 = vmul.f32 -0.5, %v2201_v8  ;;  %v1273_v10 = vmul.f32 -0.5, %v2995_v7 }
 0x27f   :  { %v3003_v18 = vpop.eup %2204  ;;  %2216 = vlog2.f32 %v1270_v61  ;;  %2033 = vmatmul.mubr.bf16.vlgmr.msra.gmra.mrb[32].mxu0 %v1407_v50  ;;  %v1381_v56 = vmul.f32 %v1733_v6, %v419_v32  ;;  %v432_v19 = vadd.f32 %v2785_v35, %v2841_v28  ;;  %v3017_v23 = vadd.f32 %v2841_v28, %v2787_v38 }
 0x280   :  { %v1297_v30 = vadd.f32 1.0, %v3003_v18  ;;  %2218 = vpow2.f32 %v1192_v46  ;;  %v1408_v3 = vpack.c.bf16 %v1379_v13, %v1378_v24  ;;  %v1292_v22 = vadd.f32 1.0, %v1291_v4 }
 0x281   :  { %v1409_v57 = vpack.c.bf16 %v1381_v56, %v1380_v14  ;;  %v1300_v53 = vmul.f32 -0.5, %v3003_v18  ;;  %v3021_v15 = vadd.f32 %v2789_v39, %v2841_v28  ;;  %v3025_v50 = vadd.f32 %v2841_v28, %v2791_v40 }
 0x282   :  { %2220 = vlog2.f32 %v1297_v30  ;;  %2036 = vmatprep.mubr.bf16.mxu0 %v1408_v3  ;;  %v1294_v25 = vand.u32 2147483647, %v2201_v8  ;;  %v3031_v31 = vadd.f32 %v2793_v21, %v2841_v28  ;;  %v3035_v17 = vadd.f32 %v2841_v28, %v2795_v41 }
 0x283   :  { %v1274_v38 = vadd.f32 1.0, %v1273_v10  ;;  %v1128_v42 = vmax.f32 %v2907_v12, 0.0  ;;  %v1126_v40 = vmax.f32 %v2922_v5, 0.0  ;;  %v1276_v9 = vand.u32 2147483647, %v2995_v7 }
 0x284   :  { %v3013_v47 = vpop.eup %2206  ;;  %v1293_v0 = vmul.f32 %v2201_v8, %v1292_v22  ;;  %v1301_v55 = vadd.f32 1.0, %v1300_v53  ;;  %vm1295_vm9 = vcmp.lt.f32.partialorder %v1294_v25, 0.0004427343  ;;  %v1129_v63 = vmax.f32 %v2925_v27, 0.0 }
 0x285   :  { %v3027_v35 = vpop.eup %2208  ;;  %v1279_v2 = vadd.f32 1.0, %v3013_v47  ;;  %v1275_v34 = vmul.f32 %v2995_v7, %v1274_v38  ;;  %v1303_v36 = vand.u32 2147483647, %v3003_v18  ;;  %v1127_v59 = vmax.f32 %v2958_v29, 0.0 }
 0x286   :  { %v2211_v39 = vpop.eup %2210  ;;  %v1324_v58 = vadd.f32 1.0, %v3027_v35  ;;  %v1282_v24 = vmul.f32 -0.5, %v3013_v47  ;;  %vm1277_vm10 = vcmp.lt.f32.partialorder %v1276_v9, 0.0004427343  ;;  %v1302_v27 = vmul.f32 %v3003_v18, %v1301_v55 }
 0x287   :  { %v3042_v45 = vpop.eup %2212  ;;  %v1290_v21 = vmul.f32 0.6931472, %v2211_v39  ;;  %2222 = vlog2.f32 %v1279_v2  ;;  %2037 = vmatmul.mubr.bf16.gmra.mrb[36].mxu0 %v1409_v57  ;;  %v1327_v49 = vmul.f32 -0.5, %v3027_v35  ;;  %v1285_v46 = vand.u32 2147483647, %v3013_v47 }
 0x288   :  { %v3044_v41 = vpop.eup %2214  ;;  %2224 = vlog2.f32 %v1324_v58  ;;  %v1306_v12 = vadd.f32 1.0, %v3042_v45  ;;  %v1309_v11 = vmul.f32 -0.5, %v3042_v45  ;;  %vm1304_vm11 = vcmp.lt.f32.partialorder %v1303_v36, 0.0004427343 }
 0x289   :  { %v2217_v5 = vpop.eup %2216  ;;  %v1296_v20 = vsel %vm1295_vm9, %v1293_v0, %v1290_v21  ;;  %v1333_v33 = vadd.f32 1.0, %v3044_v41  ;;  %v1283_v16 = vadd.f32 1.0, %v1282_v24  ;;  %v1330_v32 = vand.u32 2147483647, %v3027_v35 }
 0x28a   :  { %v3051_v8 = vpop.eup %2218  ;;  %v1352_v37 = vadd.f32 %v1296_v20, %v1128_v42  ;;  %v1272_v48 = vmul.f32 0.6931472, %v2217_v5  ;;  %2226 = vlog2.f32 %v1306_v12  ;;  %v1328_v14 = vadd.f32 1.0, %v1327_v49 }
 0x28b   :  { %v1315_v29 = vadd.f32 1.0, %v3051_v8  ;;  %2228 = vlog2.f32 %v1333_v33  ;;  %v1132_v56 = vmax.f32 %v2965_v60, 0.0  ;;  %v1310_v30 = vadd.f32 1.0, %v1309_v11 }
 0x28c   :  { %v2221_v26 = vpop.eup %2220  ;;  %v1736_v6 = vadd.f32 -0.6931472, %v1352_v37  ;;  %v1278_v52 = vsel %vm1277_vm10, %v1275_v34, %v1272_v48  ;;  %v1336_v10 = vmul.f32 -0.5, %v3044_v41  ;;  %vm3063_vm12 = vcmp.lt.f32.partialorder %v1285_v46, 0.0004427343 }
 0x28d   :  { %v1350_v7 = vadd.f32 %v1278_v52, %v1126_v40  ;;  %v1299_v54 = vmul.f32 0.6931472, %v2221_v26  ;;  %2230 = vlog2.f32 %v1315_v29  ;;  %v1130_v22 = vmax.f32 %v2976_v51, 0.0 }
 0x28e   :  { %v1384_v18 = vmul.f32 %v1736_v6, %v432_v19  ;;  %v1318_v53 = vmul.f32 -0.5, %v3051_v8  ;;  %v1284_v39 = vmul.f32 %v3013_v47, %v1283_v16  ;;  %v1312_v60 = vand.u32 2147483647, %v3042_v45 }
 0x28f   :  { %v1734_v61 = vadd.f32 -0.6931472, %v1350_v7  ;;  %v1305_v13 = vsel %vm1304_vm11, %v1302_v27, %v1299_v54  ;;  %v1329_v40 = vmul.f32 %v3027_v35, %v1328_v14  ;;  %vm1331_vm13 = vcmp.lt.f32.partialorder %v1330_v32, 0.0004427343 }
 0x290   :  { %v1353_v4 = vadd.f32 %v1305_v13, %v1129_v63  ;;  %v1339_v9 = vand.u32 2147483647, %v3044_v41  ;;  %v1311_v21 = vmul.f32 %v3042_v45, %v1310_v30  ;;  %v1319_v12 = vadd.f32 1.0, %v1318_v53 }
 0x291   :  { %v2223_v3 = vpop.eup %2222  ;;  %v1382_v25 = vmul.f32 %v1734_v61, %v3017_v23  ;;  %v1337_v23 = vadd.f32 1.0, %v1336_v10  ;;  %vm1313_vm14 = vcmp.lt.f32.partialorder %v1312_v60, 0.0004427343  ;;  %v1321_v35 = vand.u32 2147483647, %v3051_v8 }
 0x292   :  { %v2225_v38 = vpop.eup %2224  ;;  %v1737_v2 = vadd.f32 -0.6931472, %v1353_v4  ;;  %v1281_v19 = vmul.f32 0.6931472, %v2223_v3  ;;  %v1133_v48 = vmax.f32 %v2979_v1, 0.0  ;;  %v1131_v24 = vmax.f32 %v2982_v62, 0.0 }
 0x293   :  { %v1326_v42 = vmul.f32 0.6931472, %v2225_v38  ;;  %vm1340_vm15 = vcmp.lt.f32.partialorder %v1339_v9, 0.0004427343  ;;  %v1320_v26 = vmul.f32 %v3051_v8, %v1319_v12  ;;  %vm1322_vm0 = vcmp.lt.f32.partialorder %v1321_v35, 0.0004427343 }
 0x294   :  { %v2227_v58 = vpop.eup %2226  ;;  %v1287_v51 = vsel %vm3063_vm12, %v1284_v39, %v1281_v19  ;;  %v1385_v0 = vmul.f32 %v1737_v2, %v3021_v15  ;;  %v443_v8 = vadd.f32 %v2841_v28, %v2799_v44 }
 0x295   :  { %v1351_v55 = vadd.f32 %v1287_v51, %v1127_v59  ;;  %v1332_v63 = vsel %vm1331_vm13, %v1329_v40, %v1326_v42  ;;  %v1308_v47 = vmul.f32 0.6931472, %v2227_v58  ;;  %v2229_v34 = vpop.eup %2228  ;;  %v1338_v59 = vmul.f32 %v3044_v41, %v1337_v23 }
 0x296   :  { %v1356_v5 = vadd.f32 %v1332_v63, %v1132_v56  ;;  %v1411_v20 = vpack.c.bf16 %v1385_v0, %v1384_v18  ;;  %v1335_v15 = vmul.f32 0.6931472, %v2229_v34  ;;  %v451_v41 = vadd.f32 %v2797_v43, %v2841_v28 }
 0x297   :  { %v1735_v36 = vadd.f32 -0.6931472, %v1351_v55  ;;  %v1314_v37 = vsel %vm1313_vm14, %v1311_v21, %v1308_v47  ;;  %v2231_v45 = vpop.eup %2230 }
 0x298   :  { %v1740_v27 = vadd.f32 -0.6931472, %v1356_v5  ;;  %v1354_v49 = vadd.f32 %v1314_v37, %v1130_v22  ;;  %v1317_v33 = vmul.f32 0.6931472, %v2231_v45  ;;  %v1341_v11 = vsel %vm1340_vm15, %v1338_v59, %v1335_v15 }
 0x299   :  { %v1383_v6 = vmul.f32 %v1735_v36, %v3025_v50  ;;  %v1357_v1 = vadd.f32 %v1341_v11, %v1133_v48 }
 0x29a   :  { %v1738_v52 = vadd.f32 -0.6931472, %v1354_v49  ;;  %v1388_v29 = vmul.f32 %v1740_v27, %v3031_v31  ;;  %v1323_v7 = vsel %vm1322_vm0, %v1320_v26, %v1317_v33 }
 0x29b   :  { %v1410_v62 = vpack.c.bf16 %v1383_v6, %v1382_v25  ;;  %v1355_v54 = vadd.f32 %v1323_v7, %v1131_v24  ;;  %v1741_v16 = vadd.f32 -0.6931472, %v1357_v1 }
 0x29c   :  { %v1386_v46 = vmul.f32 %v1738_v52, %v3035_v17 }
 0x29d   :  { %2040 = vmatprep.mubr.bf16.mxu0 %v1410_v62  ;;  %v1739_v50 = vadd.f32 -0.6931472, %v1355_v54  ;;  %v1389_v32 = vmul.f32 %v1741_v16, %v451_v41 }
 0x29e   :  { %2041 = vmatmul.mubr.bf16.gmra.mrb[40].mxu0 %v1411_v20 }
 0x29f   :  { %v1387_v61 = vmul.f32 %v1739_v50, %v443_v8  ;;  %v1413_v13 = vpack.c.bf16 %v1389_v32, %v1388_v29 }
 0x2a1   :  { %v1412_v31 = vpack.c.bf16 %v1387_v61, %v1386_v46 }
 0x2a3   :  { %2044 = vmatprep.mubr.bf16.mxu0 %v1412_v31 }
 0x2a6   :  { %2045 = vmatmul.mubr.bf16.gmra.mrb[44].mxu0 %v1413_v13 }
 0x352   :  { %v2034_v14 = vpop.f32.mrb[32].mxu0 }
 0x353   :  { %v1496_v18 = vpop.f32.mrb[33].mxu0 }
 0x354   :  { %v2035_v4 = vpop.f32.mrb[34].mxu0 }
 0x355   :  { %v1790_v17 = vpack.c.bf16 %v2035_v4, %v2034_v14  ;;  %v1499_v56 = vpop.f32.mrb[35].mxu0 }
 0x356   :  { %v1785_v30 = vpack.c.bf16 %v1499_v56, %v1496_v18 }
 0x357   :  { %1822 = vst [vmem:[#allocation10 + $0x8] sm:$0xff] %v1790_v17  }
 0x358   :  { %1786 = vst [vmem:[#allocation10] sm:$0xff] %v1785_v30  }
 0x35a   :  { %v2038_v43 = vpop.f32.mrb[36].mxu0 }
 0x35b   :  { %v1512_v10 = vpop.f32.mrb[37].mxu0 }
 0x35c   :  { %v2039_v3 = vpop.f32.mrb[38].mxu0 }
 0x35d   :  { %v1800_v44 = vpack.c.bf16 %v2039_v3, %v2038_v43  ;;  %v1515_v28 = vpop.f32.mrb[39].mxu0 }
 0x35e   :  { %v1795_v57 = vpack.c.bf16 %v1515_v28, %v1512_v10 }
 0x35f   :  { %1824 = vst [vmem:[#allocation10 + $0x18] sm:$0xff] %v1800_v44  }
 0x360   :  { %1823 = vst [vmem:[#allocation10 + $0x10] sm:$0xff] %v1795_v57  }
 0x371   :  { %v2042_v22 = vpop.f32.mrb[40].mxu0 }
 0x372   :  { %v1528_v53 = vpop.f32.mrb[41].mxu0 }
 0x373   :  { %v2043_v25 = vpop.f32.mrb[42].mxu0 }
 0x374   :  { %v1810_v38 = vpack.c.bf16 %v2043_v25, %v2042_v22  ;;  %v1531_v2 = vpop.f32.mrb[43].mxu0 }
 0x375   :  { %v1805_v19 = vpack.c.bf16 %v1531_v2, %v1528_v53 }
 0x376   :  { %1826 = vst [vmem:[#allocation10 + $0x28] sm:$0xff] %v1810_v38  }
 0x377   :  { %1825 = vst [vmem:[#allocation10 + $0x20] sm:$0xff] %v1805_v19  }
 0x379   :  { %v2046_v39 = vpop.f32.mrb[44].mxu0 }
 0x37a   :  { %v1544_v60 = vpop.f32.mrb[45].mxu0 }
 0x37b   :  { %v2047_v42 = vpop.f32.mrb[46].mxu0 }
 0x37c   :  { %v1820_v40 = vpack.c.bf16 %v2047_v42, %v2046_v39  ;;  %v1547_v9 = vpop.f32.mrb[47].mxu0 }
 0x37d   :  { %v1815_v58 = vpack.c.bf16 %v1547_v9, %v1544_v60 }
 0x37e   :  { %1828 = vst [vmem:[#allocation10 + $0x38] sm:$0xff] %v1820_v40  }
 0x37f   :  { %1827 = vst [vmem:[#allocation10 + $0x30] sm:$0xff] %v1815_v58  }
 0x380   :  { %2331 = shalt.err (!%p2328_p8)
}
 0x381   :  { %s2332_s5 = scalar_lea.hbm %s3115_s10, 1024 }
 0x382   :  { %p2333_p9 = scmp.ne.s32.totalorder %s3115_s10, %s2332_s5  ;;  %p2336_p10 = scmp.lt.u32.totalorder %s2332_s5, %s3115_s10 }
 0x384   :  { %p2338_p11 = pnand %p2336_p10, %p2333_p9 }
 0x386   :  { %2341 = shalt.err (!%p2338_p11)
}
 0x387   :  { %1650 = dma.vmem_to_hbm [thread:$0]  %s1645_s13, 1024, %s3115_s10, [#allocation4], %s2352_s25, %s2352_s25, %s2353_s26  }
 0x388   :  { %2348 = dma.done.wait [#allocation4], 1024  }
 0x389   :  { %2349 = vsyncadd [#allocation4], 4294966272 }
 0x38a   :  { %1654 = vsyncpa [#allocation3], 1 }
 0x38b   :  { %1655 = vsyncpa [#allocation6], 1 }
 0x38c   :  { %1656 = vsyncpa [#allocation9], 1 }
 0x38d   :  { %1657 = vsyncpa [#allocation4], 1 }

</bundles_post_ra>
